<compile_context>
chip_gen: v7x
topology: tpu7x:2x2x1
jax: 0.10.0
libtpu: 0.0.40
codegen_flags: <defaults>
</compile_context>

<pallas_src>
import functools

import jax
import jax.numpy as jnp
from jax.experimental import pallas as pl
from jax.experimental.pallas import tpu as pltpu


def attention_pooling_kernel(x_ref, s_ref, e_ref, w_ref, b_ref, o_ref):
    # x_ref : [TB, C*T]  flat NCT rows (lane axis = C*T, multiple of 128)
    # s_ref : [C*T, T]   kron(w1@w2, I_T)      -> attention-score matmul
    # e_ref : [T, C*T]   tile(I_T, (1, C))     -> broadcast attn over channels on the MXU
    # w_ref : [C*T, O]   repeat(w1@w3, T, 0)   -> pooling + folded linear in one matmul
    # b_ref : [1, O]     b1@w3 + b3
    # o_ref : [TB, O]
    x = x_ref[...]                                                         # [TB, C*T]

    # attention scores on the MXU: scores[b, t] = sum_c (w1@w2)[c] * x[b, c, t]
    # (the folded score bias b1@w2 + b2 is a constant shift -> cancels in softmax)
    scores = jnp.dot(x, s_ref[...], preferred_element_type=jnp.float32)    # [TB, T]

    # numerically stable softmax over time
    m = jnp.max(scores, axis=-1, keepdims=True)                            # [TB, 1]
    e = jnp.exp(scores - m)                                                # [TB, T]
    denom = jnp.sum(e, axis=-1, keepdims=True)                             # [TB, 1]
    inv = pl.reciprocal(denom, approx=True)                                # EUP vrcp (free slot)
    inv = inv * (2.0 - denom * inv)                                        # one Newton step
    attn = e * inv                                                         # [TB, T]

    # broadcast attn over channels on the MXU: attn_big[b, c*T + t] = attn[b, t]
    attn_big = jnp.dot(attn, e_ref[...], preferred_element_type=jnp.float32)   # [TB, C*T]

    # weighted pooling + folded linear in one MXU matmul:
    #   out[b, o] = sum_{c,t} x[b,c,t] * attn[b,t] * (w1@w3)[c,o] + b_out[o]
    out = jnp.dot(x * attn_big, w_ref[...],
                  preferred_element_type=jnp.float32) + b_ref[...]         # [TB, O]
    o_ref[...] = out.astype(o_ref.dtype)


@functools.partial(jax.jit, static_argnames=("batch_tile",))
def attention_pooling(x_nct, w1, b1, w2, b2, w3, b3, *, batch_tile=1024):
    """x_nct: [B, C, T] float32 (same NCT layout PyTorch consumes). Returns [B, out_dim]."""
    B, C, T = x_nct.shape
    O = w3.shape[1]
    CT = C * T

    # ---- fold the two k=1 convs and the linear (done once, outside the kernel) ----
    #   scores = x^T (w1 w2) + const                       (const cancels in softmax)
    #   out    = (sum_t a_t x_t)^T (w1 w3) + (b1 w3 + b3)  (softmax weights sum to 1)
    w_score = (w1 @ w2).reshape(C)                               # [C]
    w_out = w1 @ w3                                              # [C, O]
    b_out = (b1 @ w3 + b3).reshape(1, O)                         # [1, O]

    # ---- expand the folded weights so every reduction over x runs on the MXU ----
    eye_t = jnp.eye(T, dtype=jnp.float32)
    s_mat = jnp.kron(w_score.reshape(C, 1), eye_t)               # [C*T, T]
    e_mat = jnp.tile(eye_t, (1, C))                              # [T, C*T]
    w_big = jnp.repeat(w_out, T, axis=0)                         # [C*T, O]

    # Flat, lane-dense view of x: metadata-only reshape of the contiguous NCT array,
    # so the kernel's lane axis is C*T instead of T.
    x2 = x_nct.reshape(B, CT)

    # Batch tiling: TB rows per grid step.  At TB=1024 the x block is ~2 MiB (double-
    # buffered ~4 MiB) + a few MiB of f32 temporaries -- inside the 32 MiB VMEM limit on
    # every generation.  Non-divisible B is handled by the partial last block (no HBM
    # pad-copy of x): rows past B hold stale VMEM, but all compute is per-row and Pallas
    # only writes the valid rows back.
    TB = min(batch_tile, B)
    n_tiles = pl.cdiv(B, TB)

    out = pl.pallas_call(
        attention_pooling_kernel,
        out_shape=jax.ShapeDtypeStruct((B, O), jnp.float32),
        grid_spec=pl.GridSpec(
            grid=(n_tiles,),
            in_specs=[
                # NOTE(v7x): add pipeline_mode=pl.Buffered(3) here if xprof still shows
                # exposed DMA at large batch_tile.
                pl.BlockSpec((TB, CT), lambda b: (b, 0)),
                # constant-index blocks: expanded weights DMA once and stay VMEM-resident
                pl.BlockSpec((CT, T), lambda b: (0, 0)),
                pl.BlockSpec((T, CT), lambda b: (0, 0)),
                pl.BlockSpec((CT, O), lambda b: (0, 0)),
                pl.BlockSpec((1, O), lambda b: (0, 0)),
            ],
            out_specs=pl.BlockSpec((TB, O), lambda b: (b, 0)),
        ),
        compiler_params=pltpu.CompilerParams(
            # batch tiles are independent -> megacore sharding on v7x, no-op on v5e/v6e
            dimension_semantics=("parallel",),
            # raise v5e/v6e's 16 MiB scoped-VMEM default; 32 MiB is also safe on v7x (64 MiB)
            vmem_limit_bytes=32 * 1024 * 1024,
        ),
    )(x2, s_mat, e_mat, w_big, b_out)

    return out


def attention_pooling_ref(x_nct, w1, b1, w2, b2, w3, b3):
    """Plain-JAX reference mirroring the (unfused) PyTorch forward, at full f32 precision."""
    hi = jax.lax.Precision.HIGHEST
    x_exp = jnp.einsum("bct,cp->bpt", x_nct, w1, precision=hi) + b1[None, :, None]  # [B, P, T]
    scores = jnp.einsum("bpt,p->bt", x_exp, w2[:, 0], precision=hi) + b2[0]          # [B, T]
    attn = jax.nn.softmax(scores, axis=-1)                                            # [B, T]
    pooled = jnp.sum(x_exp * attn[:, None, :], axis=-1)                               # [B, P]
    return jnp.dot(pooled, w3, precision=hi) + b3[None, :]                            # [B, O]


if __name__ == "__main__":
    # module hyper-params: n_hidden_channels=32, pooling_channels=16, out_dim=8
    B, C, T, P, O = 2, 32, 16, 16, 8

    key = jax.random.PRNGKey(0)
    ks = jax.random.split(key, 7)
    x = jax.random.normal(ks[0], (B, C, T), dtype=jnp.float32)

    # parameters (shapes match nn.Conv1d / nn.Linear with k=1 squeezed; stored as [in, out])
    w1 = jax.random.normal(ks[1], (C, P), dtype=jnp.float32) * 0.1     # x_exp conv
    b1 = jax.random.normal(ks[2], (P,), dtype=jnp.float32) * 0.1
    w2 = jax.random.normal(ks[3], (P, 1), dtype=jnp.float32) * 0.1     # attn conv
    b2 = jax.random.normal(ks[4], (1,), dtype=jnp.float32) * 0.1
    w3 = jax.random.normal(ks[5], (P, O), dtype=jnp.float32) * 0.1     # linear
    b3 = jax.random.normal(ks[6], (O,), dtype=jnp.float32) * 0.1

    out = attention_pooling(x, w1, b1, w2, b2, w3, b3)
    out = jax.block_until_ready(out)

    ref = attention_pooling_ref(x, w1, b1, w2, b2, w3, b3)
    assert out.shape == (B, O)
    # 1e-3 tolerance: the in-kernel reductions now run on the MXU, whose f32 matmuls may use
    # a multi-pass bf16 decomposition; any algebraic/layout bug would be orders larger.
    assert jnp.allclose(out, ref, atol=1e-3, rtol=1e-3), "mismatch vs reference"

    print("KERNEL_OK")
</pallas_src>

<mosaic_0001>
module attributes {stable_mosaic.version = 11 : i64} {
  func.func @attention_pooling_kernel(%arg0: i32, %arg1: memref<2x512xf32, #tpu.memory_space<vmem>>, %arg2: memref<512x16xf32, #tpu.memory_space<vmem>>, %arg3: memref<16x512xf32, #tpu.memory_space<vmem>>, %arg4: memref<512x8xf32, #tpu.memory_space<vmem>>, %arg5: memref<1x8xf32, #tpu.memory_space<vmem>>, %arg6: memref<2x8xf32, #tpu.memory_space<vmem>>) attributes {dimension_semantics = [#tpu.dimension_semantics<parallel>], iteration_bounds = array<i64: 1>, scalar_prefetch = 0 : i64, scratch_operands = 0 : i64, tpu.core_type = #tpu.core_type<tc>, window_params = [{transform_indices = @transform_0, window_bounds = array<i64: 2, 512>}, {pipeline_mode = #tpu.pipeline_mode<synchronous>, transform_indices = @transform_1, window_bounds = array<i64: 512, 16>}, {pipeline_mode = #tpu.pipeline_mode<synchronous>, transform_indices = @transform_2, window_bounds = array<i64: 16, 512>}, {pipeline_mode = #tpu.pipeline_mode<synchronous>, transform_indices = @transform_3, window_bounds = array<i64: 512, 8>}, {pipeline_mode = #tpu.pipeline_mode<synchronous>, transform_indices = @transform_4, window_bounds = array<i64: 1, 8>}, {transform_indices = @transform_5, window_bounds = array<i64: 2, 8>}]} {
    %c0 = arith.constant 0 : index
    %c0_0 = arith.constant 0 : index
    %0 = vector.load %arg1[%c0, %c0_0] : memref<2x512xf32, #tpu.memory_space<vmem>>, vector<2x512xf32>
    %c0_1 = arith.constant 0 : index
    %c0_2 = arith.constant 0 : index
    %1 = vector.load %arg2[%c0_1, %c0_2] : memref<512x16xf32, #tpu.memory_space<vmem>>, vector<512x16xf32>
    %cst = arith.constant dense<0.000000e+00> : vector<2x16xf32>
    %2 = tpu.matmul %0, %1, %cst {dimension_numbers = #tpu.dot_dimension_numbers<[1], [0], [0], [1], [0, 0, 1, 1], [], []>} : vector<2x512xf32>, vector<512x16xf32>, vector<2x16xf32> -> vector<2x16xf32>
    %cst_3 = arith.constant dense<0xFF800000> : vector<2xf32>
    %3 = vector.multi_reduction <maximumf>, %2, %cst_3 [1] : vector<2x16xf32> to vector<2xf32>
    %4 = vector.shape_cast %3 : vector<2xf32> to vector<2x1xf32>
    %5 = vector.broadcast %4 : vector<2x1xf32> to vector<2x16xf32>
    %6 = arith.subf %2, %5 : vector<2x16xf32>
    %7 = math.exp %6 : vector<2x16xf32>
    %cst_4 = arith.constant dense<0.000000e+00> : vector<2xf32>
    %8 = vector.multi_reduction <add>, %7, %cst_4 [1] : vector<2x16xf32> to vector<2xf32>
    %9 = vector.shape_cast %8 : vector<2xf32> to vector<2x1xf32>
    %10 = tpu.reciprocal %9 {approx = true} : vector<2x1xf32> -> vector<2x1xf32>
    %11 = arith.mulf %9, %10 : vector<2x1xf32>
    %cst_5 = arith.constant 2.000000e+00 : f32
    %12 = vector.broadcast %cst_5 : f32 to vector<2x1xf32>
    %13 = arith.subf %12, %11 : vector<2x1xf32>
    %14 = arith.mulf %10, %13 : vector<2x1xf32>
    %15 = vector.broadcast %14 : vector<2x1xf32> to vector<2x16xf32>
    %16 = arith.mulf %7, %15 : vector<2x16xf32>
    %c0_6 = arith.constant 0 : index
    %c0_7 = arith.constant 0 : index
    %17 = vector.load %arg3[%c0_6, %c0_7] : memref<16x512xf32, #tpu.memory_space<vmem>>, vector<16x512xf32>
    %cst_8 = arith.constant dense<0.000000e+00> : vector<2x512xf32>
    %18 = tpu.matmul %16, %17, %cst_8 {dimension_numbers = #tpu.dot_dimension_numbers<[1], [0], [0], [1], [0, 0, 1, 1], [], []>} : vector<2x16xf32>, vector<16x512xf32>, vector<2x512xf32> -> vector<2x512xf32>
    %19 = arith.mulf %0, %18 : vector<2x512xf32>
    %c0_9 = arith.constant 0 : index
    %c0_10 = arith.constant 0 : index
    %20 = vector.load %arg4[%c0_9, %c0_10] : memref<512x8xf32, #tpu.memory_space<vmem>>, vector<512x8xf32>
    %cst_11 = arith.constant dense<0.000000e+00> : vector<2x8xf32>
    %21 = tpu.matmul %19, %20, %cst_11 {dimension_numbers = #tpu.dot_dimension_numbers<[1], [0], [0], [1], [0, 0, 1, 1], [], []>} : vector<2x512xf32>, vector<512x8xf32>, vector<2x8xf32> -> vector<2x8xf32>
    %c0_12 = arith.constant 0 : index
    %c0_13 = arith.constant 0 : index
    %22 = vector.load %arg5[%c0_12, %c0_13] : memref<1x8xf32, #tpu.memory_space<vmem>>, vector<1x8xf32>
    %23 = vector.broadcast %22 : vector<1x8xf32> to vector<2x8xf32>
    %24 = arith.addf %21, %23 : vector<2x8xf32>
    %c0_14 = arith.constant 0 : index
    %c0_15 = arith.constant 0 : index
    %25 = vector.load %arg6[%c0_14, %c0_15] : memref<2x8xf32, #tpu.memory_space<vmem>>, vector<2x8xf32>
    tpu.vector_store %arg6[%c0_14, %c0_15], %24 {strides = array<i32>} : memref<2x8xf32, #tpu.memory_space<vmem>>, vector<2x8xf32>,
    return
  }
  func.func @transform_0(%arg0: i32) -> (i32, i32) {
    %c0_i32 = arith.constant 0 : i32
    %c0_i32_0 = arith.constant 0 : i32
    return %arg0, %c0_i32 : i32, i32
  }
  func.func @transform_1(%arg0: i32) -> (i32, i32) {
    %c0_i32 = arith.constant 0 : i32
    %c0_i32_0 = arith.constant 0 : i32
    %c0_i32_1 = arith.constant 0 : i32
    return %c0_i32, %c0_i32_0 : i32, i32
  }
  func.func @transform_2(%arg0: i32) -> (i32, i32) {
    %c0_i32 = arith.constant 0 : i32
    %c0_i32_0 = arith.constant 0 : i32
    %c0_i32_1 = arith.constant 0 : i32
    return %c0_i32, %c0_i32_0 : i32, i32
  }
  func.func @transform_3(%arg0: i32) -> (i32, i32) {
    %c0_i32 = arith.constant 0 : i32
    %c0_i32_0 = arith.constant 0 : i32
    %c0_i32_1 = arith.constant 0 : i32
    return %c0_i32, %c0_i32_0 : i32, i32
  }
  func.func @transform_4(%arg0: i32) -> (i32, i32) {
    %c0_i32 = arith.constant 0 : i32
    %c0_i32_0 = arith.constant 0 : i32
    %c0_i32_1 = arith.constant 0 : i32
    return %c0_i32, %c0_i32_0 : i32, i32
  }
  func.func @transform_5(%arg0: i32) -> (i32, i32) {
    %c0_i32 = arith.constant 0 : i32
    %c0_i32_0 = arith.constant 0 : i32
    return %arg0, %c0_i32 : i32, i32
  }
}

</mosaic_0001>

<bundles_post_ra>
// kernel: tile.9
= control target key start
LH: loop header
LB: loop body
LE: loop exit
PB: predicated region body
PF: predicated region fallthrough
CT: control target
= control target key end

     0   :  { %vm91_vm0 = vcmask 1041409   ;;  %vm95_vm1 = vcmask 1042434   ;;  %vm99_vm2 = vcmask 1043459   ;;  %vm103_vm3 = vcmask 1044484   ;;  %s2573_s25 = smov 112   ;;  %s2574_s10 = smov 96   ;;  %s4759_s0 = inlined_call_operand.vmem [shape: f32[16,32,16], index: 0, kind: input, shape index: {}]   ;;  %s4760_s1 = inlined_call_operand.vmem [shape: f32[16,512], index: 1, kind: output, shape index: {}]  }
   0x1   :  { %vm107_vm4 = vcmask 1045509   ;;  %vm111_vm5 = vcmask 1046534   ;;  %v2086_v0 = vld [vmem:[%s4759_s0 + $0xf] sm:$0x1]   ;;  %vm115_vm6 = vcmask 1047559   ;;  %s2575_s23 = smov 80  }
   0x2   :  { %v2087_v1 = vld [vmem:[%s4759_s0 + $0x2e] sm:$0x2]   ;;  %v2069_v9 = vld [vmem:[%s4759_s0 + $0x7] sm:$0x1]   ;;  %v2113_v52 = vld [vmem:[%s4759_s0 + $0x117] sm:$0x1]  }
   0x3   :  { %v2088_v2 = vld [vmem:[%s4759_s0 + $0x4d] sm:$0x4]   ;;  %v161_v4 = vsel %vm91_vm0, %v2087_v1, %v2086_v0  ;;  %v2070_v10 = vld [vmem:[%s4759_s0 + $0x26] sm:$0x2]   ;;  %v2114_v53 = vld [vmem:[%s4759_s0 + $0x136] sm:$0x2]  }
   0x4   :  { %v2089_v3 = vld [vmem:[%s4759_s0 + $0x6c] sm:$0x8]   ;;  %v165_v7 = vsel %vm95_vm1, %v2088_v2, %v161_v4  ;;  %v92_v12 = vsel %vm91_vm0, %v2070_v10, %v2069_v9  ;;  %v2071_v13 = vld [vmem:[%s4759_s0 + $0x45] sm:$0x4]   ;;  %v266_v56 = vsel %vm91_vm0, %v2114_v53, %v2113_v52  ;;  %v2115_v57 = vld [vmem:[%s4759_s0 + $0x155] sm:$0x4]  }
   0x5   :  { %v2090_v5 = vld [vmem:[%s4759_s0 + $0x8b] sm:$0x10]   ;;  %v169_v11 = vsel %vm99_vm2, %v2089_v3, %v165_v7  ;;  %v2072_v14 = vld [vmem:[%s4759_s0 + $0x64] sm:$0x8]   ;;  %v96_v18 = vsel %vm95_vm1, %v2071_v13, %v92_v12  ;;  %v2116_v58 = vld [vmem:[%s4759_s0 + $0x174] sm:$0x8]   ;;  %v270_v63 = vsel %vm95_vm1, %v2115_v57, %v266_v56 }
   0x6   :  { %v2091_v6 = vld [vmem:[%s4759_s0 + $0xaa] sm:$0x20]   ;;  %v2073_v15 = vld [vmem:[%s4759_s0 + $0x83] sm:$0x10]   ;;  %v173_v16 = vsel %vm103_vm3, %v2090_v5, %v169_v11  ;;  %v100_v22 = vsel %vm99_vm2, %v2072_v14, %v96_v18  ;;  %v2117_v59 = vld [vmem:[%s4759_s0 + $0x193] sm:$0x10]   ;;  %v274_v3 = vsel %vm99_vm2, %v2116_v58, %v270_v63 }
   0x7   :  { %v2092_v8 = vld [vmem:[%s4759_s0 + $0xc9] sm:$0x40]   ;;  %v2074_v19 = vld [vmem:[%s4759_s0 + $0xa2] sm:$0x20]   ;;  %v177_v21 = vsel %vm107_vm4, %v2091_v6, %v173_v16  ;;  %v104_v27 = vsel %vm103_vm3, %v2073_v15, %v100_v22  ;;  %v2118_v0 = vld [vmem:[%s4759_s0 + $0x1b2] sm:$0x20]  }
   0x8   :  { %v2093_v17 = vld [vmem:[%s4759_s0 + $0xe8] sm:$0x80]   ;;  %v2075_v20 = vld [vmem:[%s4759_s0 + $0xc1] sm:$0x40]   ;;  %v181_v26 = vsel %vm111_vm5, %v2092_v8, %v177_v21  ;;  %v108_v33 = vsel %vm107_vm4, %v2074_v19, %v104_v27  ;;  %v2119_v1 = vld [vmem:[%s4759_s0 + $0x1d1] sm:$0x40]   ;;  %v278_v8 = vsel %vm103_vm3, %v2117_v59, %v274_v3 }
   0x9   :  { %v2095_v23 = vld [vmem:[%s4759_s0 + $0x10f] sm:$0x1]   ;;  %v2076_v28 = vld [vmem:[%s4759_s0 + $0xe0] sm:$0x80]   ;;  %v185_v32 = vsel %vm115_vm6, %v2093_v17, %v181_v26  ;;  %v112_v38 = vsel %vm111_vm5, %v2075_v20, %v108_v33  ;;  %v2104_v4 = vld [vmem:[%s4759_s0 + $0x17] sm:$0x1]   ;;  %v282_v14 = vsel %vm107_vm4, %v2118_v0, %v278_v8 }
   0xa   :  { %v2096_v24 = vld [vmem:[%s4759_s0 + $0x12e] sm:$0x2]   ;;  %v2077_v37 = vld [vmem:[%s4759_s0 + $0x107] sm:$0x1]   ;;  %186 = vrot.lane.b32.xlu1 %v185_v32, %s2573_s25  ;;  %v116_v43 = vsel %vm115_vm6, %v2076_v28, %v112_v38  ;;  %v2105_v5 = vld [vmem:[%s4759_s0 + $0x36] sm:$0x2]   ;;  %v286_v19 = vsel %vm111_vm5, %v2119_v1, %v282_v14 }
   0xb   :  { %v2097_v25 = vld [vmem:[%s4759_s0 + $0x14d] sm:$0x4]   ;;  %v196_v29 = vsel %vm91_vm0, %v2096_v24, %v2095_v23  ;;  %v2078_v40 = vld [vmem:[%s4759_s0 + $0x126] sm:$0x2]   ;;  %117 = vrot.lane.b32.xlu0 %v116_v43, %s2573_s25  ;;  %v2106_v6 = vld [vmem:[%s4759_s0 + $0x55] sm:$0x4]   ;;  %v231_v10 = vsel %vm91_vm0, %v2105_v5, %v2104_v4 }
   0xc   :  { %v2098_v30 = vld [vmem:[%s4759_s0 + $0x16c] sm:$0x8]   ;;  %v200_v34 = vsel %vm95_vm1, %v2097_v25, %v196_v29  ;;  %v2079_v41 = vld [vmem:[%s4759_s0 + $0x145] sm:$0x4]   ;;  %v126_v46 = vsel %vm91_vm0, %v2078_v40, %v2077_v37  ;;  %v2120_v9 = vld [vmem:[%s4759_s0 + $0x1f0] sm:$0x80]   ;;  %v235_v15 = vsel %vm95_vm1, %v2106_v6, %v231_v10 }
   0xd   :  { %v2099_v31 = vld [vmem:[%s4759_s0 + $0x18b] sm:$0x10]   ;;  %v204_v39 = vsel %vm99_vm2, %v2098_v30, %v200_v34  ;;  %v2080_v42 = vld [vmem:[%s4759_s0 + $0x164] sm:$0x8]   ;;  %v130_v50 = vsel %vm95_vm1, %v2079_v41, %v126_v46  ;;  %v2107_v11 = vld [vmem:[%s4759_s0 + $0x74] sm:$0x8]   ;;  %v290_v24 = vsel %vm115_vm6, %v2120_v9, %v286_v19 }
   0xe   :  { %v2100_v35 = vld [vmem:[%s4759_s0 + $0x1aa] sm:$0x20]   ;;  %v208_v44 = vsel %vm103_vm3, %v2099_v31, %v204_v39  ;;  %v2081_v47 = vld [vmem:[%s4759_s0 + $0x183] sm:$0x10]   ;;  %v134_v55 = vsel %vm99_vm2, %v2080_v42, %v130_v50  ;;  %v2108_v12 = vld [vmem:[%s4759_s0 + $0x93] sm:$0x10]   ;;  %v239_v20 = vsel %vm99_vm2, %v2107_v11, %v235_v15 }
   0xf   :  { %v2101_v36 = vld [vmem:[%s4759_s0 + $0x1c9] sm:$0x40]   ;;  %v2082_v48 = vld [vmem:[%s4759_s0 + $0x1a2] sm:$0x20]   ;;  %v212_v49 = vsel %vm107_vm4, %v2100_v35, %v208_v44  ;;  %v138_v61 = vsel %vm103_vm3, %v2081_v47, %v134_v55  ;;  %v2109_v16 = vld [vmem:[%s4759_s0 + $0xb2] sm:$0x20]   ;;  %v243_v25 = vsel %vm103_vm3, %v2108_v12, %v239_v20 }
  0x10   :  { %v2102_v45 = vld [vmem:[%s4759_s0 + $0x1e8] sm:$0x80]   ;;  %v2083_v51 = vld [vmem:[%s4759_s0 + $0x1c1] sm:$0x40]   ;;  %v216_v54 = vsel %vm111_vm5, %v2101_v36, %v212_v49  ;;  %v142_v2 = vsel %vm107_vm4, %v2082_v48, %v138_v61  ;;  %v2110_v17 = vld [vmem:[%s4759_s0 + $0xd1] sm:$0x40]   ;;  %v247_v30 = vsel %vm107_vm4, %v2109_v16, %v243_v25 }
  0x11   :  { %v220_v60 = vsel %vm115_vm6, %v2102_v45, %v216_v54  ;;  %v2084_v62 = vld [vmem:[%s4759_s0 + $0x1e0] sm:$0x80]   ;;  %v146_v7 = vsel %vm111_vm5, %v2083_v51, %v142_v2  ;;  %v2131_v18 = vld [vmem:[%s4759_s0 + $0x11f] sm:$0x1]   ;;  %v2111_v26 = vld [vmem:[%s4759_s0 + $0xf0] sm:$0x80]   ;;  %v251_v35 = vsel %vm111_vm5, %v2110_v17, %v247_v30 }
  0x12   :  { %221 = vrot.lane.b32.xlu1 %v220_v60, %s2573_s25  ;;  %v150_v13 = vsel %vm115_vm6, %v2084_v62, %v146_v7  ;;  %v2132_v21 = vld [vmem:[%s4759_s0 + $0x13e] sm:$0x2]   ;;  %v255_v41 = vsel %vm115_vm6, %v2111_v26, %v251_v35  ;;  %v2148_v49 = vld [vmem:[%s4759_s0 + $0x106] sm:$0x1]   ;;  %v2166_v14 = vld [vmem:[%s4759_s0 + $0x10e] sm:$0x1]  }
  0x13   :  { %151 = vrot.lane.b32.xlu0 %v150_v13, %s2573_s25  ;;  %v2133_v22 = vld [vmem:[%s4759_s0 + $0x15d] sm:$0x4]   ;;  %v336_v27 = vsel %vm91_vm0, %v2132_v21, %v2131_v18  ;;  %v2149_v50 = vld [vmem:[%s4759_s0 + $0x125] sm:$0x2]   ;;  %v2167_v15 = vld [vmem:[%s4759_s0 + $0x12d] sm:$0x2]  }
  0x14   :  { %v2134_v23 = vld [vmem:[%s4759_s0 + $0x17c] sm:$0x8]   ;;  %v340_v31 = vsel %vm95_vm1, %v2133_v22, %v336_v27  ;;  %v2150_v51 = vld [vmem:[%s4759_s0 + $0x144] sm:$0x4]   ;;  %v405_v55 = vsel %vm91_vm0, %v2149_v50, %v2148_v49  ;;  %v475_v18 = vsel %vm91_vm0, %v2167_v15, %v2166_v14  ;;  %v2168_v19 = vld [vmem:[%s4759_s0 + $0x14c] sm:$0x4]  }
  0x15   :  { %v2135_v28 = vld [vmem:[%s4759_s0 + $0x19b] sm:$0x10]   ;;  %v344_v36 = vsel %vm99_vm2, %v2134_v23, %v340_v31  ;;  %v2151_v56 = vld [vmem:[%s4759_s0 + $0x163] sm:$0x8]   ;;  %v409_v60 = vsel %vm95_vm1, %v2150_v51, %v405_v55  ;;  %v2169_v20 = vld [vmem:[%s4759_s0 + $0x16b] sm:$0x8]   ;;  %v479_v25 = vsel %vm95_vm1, %v2168_v19, %v475_v18 }
  0x16   :  { %v2136_v29 = vld [vmem:[%s4759_s0 + $0x1ba] sm:$0x20]   ;;  %291 = vrot.lane.b32.xlu1 %v290_v24, %s2573_s25  ;;  %v348_v42 = vsel %vm103_vm3, %v2135_v28, %v344_v36  ;;  %v2152_v57 = vld [vmem:[%s4759_s0 + $0x182] sm:$0x10]   ;;  %v413_v1 = vsel %vm99_vm2, %v2151_v56, %v409_v60  ;;  %v2170_v21 = vld [vmem:[%s4759_s0 + $0x18a] sm:$0x10]  }
  0x17   :  { %v2137_v32 = vld [vmem:[%s4759_s0 + $0x1d9] sm:$0x40]   ;;  %256 = vrot.lane.b32.xlu0 %v255_v41, %s2573_s25  ;;  %v352_v47 = vsel %vm107_vm4, %v2136_v29, %v348_v42  ;;  %v2153_v61 = vld [vmem:[%s4759_s0 + $0x1a1] sm:$0x20]   ;;  %v417_v6 = vsel %vm103_vm3, %v2152_v57, %v413_v1  ;;  %v2171_v26 = vld [vmem:[%s4759_s0 + $0x1a9] sm:$0x20]   ;;  %v483_v29 = vsel %vm99_vm2, %v2169_v20, %v479_v25 }
  0x18   :  { %v2122_v33 = vld [vmem:[%s4759_s0 + $0x1f] sm:$0x1]   ;;  %v356_v52 = vsel %vm111_vm5, %v2137_v32, %v352_v47  ;;  %v2154_v62 = vld [vmem:[%s4759_s0 + $0x1c0] sm:$0x40]   ;;  %v421_v11 = vsel %vm107_vm4, %v2153_v61, %v417_v6  ;;  %v2172_v27 = vld [vmem:[%s4759_s0 + $0x1c8] sm:$0x40]  }
  0x19   :  { %v2123_v34 = vld [vmem:[%s4759_s0 + $0x3e] sm:$0x2]   ;;  %v2140_v63 = vld [vmem:[%s4759_s0 + $0x6] sm:$0x1]   ;;  %v425_v16 = vsel %vm111_vm5, %v2154_v62, %v421_v11  ;;  %v2157_v30 = vld [vmem:[%s4759_s0 + $0xe] sm:$0x1]  }
  0x1a   :  { %v301_v37 = vsel %vm91_vm0, %v2123_v34, %v2122_v33  ;;  %v2124_v38 = vld [vmem:[%s4759_s0 + $0x5d] sm:$0x4]   ;;  %v2141_v2 = vld [vmem:[%s4759_s0 + $0x25] sm:$0x2]   ;;  %v2158_v31 = vld [vmem:[%s4759_s0 + $0x2d] sm:$0x2]   ;;  %v487_v34 = vsel %vm103_vm3, %v2170_v21, %v483_v29 }
  0x1b   :  { %v2125_v39 = vld [vmem:[%s4759_s0 + $0x7c] sm:$0x8]   ;;  %v305_v44 = vsel %vm95_vm1, %v2124_v38, %v301_v37  ;;  %v2142_v3 = vld [vmem:[%s4759_s0 + $0x44] sm:$0x4]   ;;  %v371_v8 = vsel %vm91_vm0, %v2141_v2, %v2140_v63  ;;  %v2159_v32 = vld [vmem:[%s4759_s0 + $0x4c] sm:$0x4]   ;;  %v440_v36 = vsel %vm91_vm0, %v2158_v31, %v2157_v30 }
  0x1c   :  { %v2126_v40 = vld [vmem:[%s4759_s0 + $0x9b] sm:$0x10]   ;;  %v309_v48 = vsel %vm99_vm2, %v2125_v39, %v305_v44  ;;  %v2143_v4 = vld [vmem:[%s4759_s0 + $0x63] sm:$0x8]   ;;  %v375_v12 = vsel %vm95_vm1, %v2142_v3, %v371_v8  ;;  %v2173_v35 = vld [vmem:[%s4759_s0 + $0x1e7] sm:$0x80]   ;;  %v444_v41 = vsel %vm95_vm1, %v2159_v32, %v440_v36 }
  0x1d   :  { %v2138_v43 = vld [vmem:[%s4759_s0 + $0x1f8] sm:$0x80]   ;;  %v313_v53 = vsel %vm103_vm3, %v2126_v40, %v309_v48  ;;  %v2155_v7 = vld [vmem:[%s4759_s0 + $0x1df] sm:$0x80]   ;;  %v379_v17 = vsel %vm99_vm2, %v2143_v4, %v375_v12  ;;  %v2160_v37 = vld [vmem:[%s4759_s0 + $0x6b] sm:$0x8]   ;;  %v491_v40 = vsel %vm107_vm4, %v2171_v26, %v487_v34 }
  0x1e   :  { %v2127_v45 = vld [vmem:[%s4759_s0 + $0xba] sm:$0x20]   ;;  %v360_v58 = vsel %vm115_vm6, %v2138_v43, %v356_v52  ;;  %v2144_v9 = vld [vmem:[%s4759_s0 + $0x82] sm:$0x10]   ;;  %v429_v22 = vsel %vm115_vm6, %v2155_v7, %v425_v16  ;;  %v2161_v38 = vld [vmem:[%s4759_s0 + $0x8a] sm:$0x10]  }
  0x1f   :  { %v2128_v46 = vld [vmem:[%s4759_s0 + $0xd9] sm:$0x40]   ;;  %v317_v59 = vsel %vm107_vm4, %v2127_v45, %v313_v53  ;;  %361 = vrot.lane.b32.xlu1 %v360_v58, %s2573_s25  ;;  %v2145_v10 = vld [vmem:[%s4759_s0 + $0xa1] sm:$0x20]   ;;  %v383_v23 = vsel %vm103_vm3, %v2144_v9, %v379_v17  ;;  %v2162_v42 = vld [vmem:[%s4759_s0 + $0xa9] sm:$0x20]   ;;  %v495_v45 = vsel %vm111_vm5, %v2172_v27, %v491_v40 }
  0x20   :  { %v2129_v54 = vld [vmem:[%s4759_s0 + $0xf8] sm:$0x80]   ;;  %v321_v0 = vsel %vm111_vm5, %v2128_v46, %v317_v59  ;;  %v2146_v13 = vld [vmem:[%s4759_s0 + $0xc0] sm:$0x40]   ;;  %v387_v28 = vsel %vm107_vm4, %v2145_v10, %v383_v23  ;;  %v2163_v43 = vld [vmem:[%s4759_s0 + $0xc8] sm:$0x40]   ;;  %v448_v46 = vsel %vm99_vm2, %v2160_v37, %v444_v41  ;;  %v499_v50 = vsel %vm115_vm6, %v2173_v35, %v495_v45 }
  0x21   :  { %v325_v5 = vsel %vm115_vm6, %v2129_v54, %v321_v0  ;;  %v2147_v24 = vld [vmem:[%s4759_s0 + $0xdf] sm:$0x80]   ;;  %v391_v33 = vsel %vm111_vm5, %v2146_v13, %v387_v28  ;;  %v2184_v44 = vld [vmem:[%s4759_s0 + $0x116] sm:$0x1]   ;;  %v452_v51 = vsel %vm103_vm3, %v2161_v38, %v448_v46  ;;  %v2164_v52 = vld [vmem:[%s4759_s0 + $0xe7] sm:$0x80]  }
  0x22   :  { %326 = vrot.lane.b32.xlu0 %v325_v5, %s2573_s25  ;;  %v395_v39 = vsel %vm115_vm6, %v2147_v24, %v391_v33  ;;  %v2185_v47 = vld [vmem:[%s4759_s0 + $0x135] sm:$0x2]   ;;  %v456_v56 = vsel %vm107_vm4, %v2162_v42, %v452_v51  ;;  %v2202_v11 = vld [vmem:[%s4759_s0 + $0x11e] sm:$0x1]   ;;  %v2219_v40 = vld [vmem:[%s4759_s0 + $0x105] sm:$0x1]  }
  0x23   :  { %430 = vrot.lane.b32.xlu1 %v429_v22, %s2574_s10  ;;  %v2186_v48 = vld [vmem:[%s4759_s0 + $0x154] sm:$0x4]   ;;  %v545_v53 = vsel %vm91_vm0, %v2185_v47, %v2184_v44  ;;  %v460_v61 = vsel %vm111_vm5, %v2163_v43, %v456_v56  ;;  %v2203_v12 = vld [vmem:[%s4759_s0 + $0x13d] sm:$0x2]   ;;  %v2220_v41 = vld [vmem:[%s4759_s0 + $0x124] sm:$0x2]  }
  0x24   :  { %v2187_v49 = vld [vmem:[%s4759_s0 + $0x173] sm:$0x8]   ;;  %v549_v57 = vsel %vm95_vm1, %v2186_v48, %v545_v53  ;;  %v464_v3 = vsel %vm115_vm6, %v2164_v52, %v460_v61  ;;  %v2204_v13 = vld [vmem:[%s4759_s0 + $0x15c] sm:$0x4]   ;;  %v615_v17 = vsel %vm91_vm0, %v2203_v12, %v2202_v11  ;;  %v684_v44 = vsel %vm91_vm0, %v2220_v41, %v2219_v40  ;;  %v2221_v45 = vld [vmem:[%s4759_s0 + $0x143] sm:$0x4]  }
  0x25   :  { %v2188_v54 = vld [vmem:[%s4759_s0 + $0x192] sm:$0x10]   ;;  %v553_v62 = vsel %vm99_vm2, %v2187_v49, %v549_v57  ;;  %v2205_v18 = vld [vmem:[%s4759_s0 + $0x17b] sm:$0x8]   ;;  %v619_v22 = vsel %vm95_vm1, %v2204_v13, %v615_v17  ;;  %v2222_v46 = vld [vmem:[%s4759_s0 + $0x162] sm:$0x8]   ;;  %v688_v51 = vsel %vm95_vm1, %v2221_v45, %v684_v44 }
  0x26   :  { %396 = vrot.lane.b32.xlu0 %v395_v39, %s2574_s10  ;;  %v2189_v55 = vld [vmem:[%s4759_s0 + $0x1b1] sm:$0x20]   ;;  %v557_v4 = vsel %vm103_vm3, %v2188_v54, %v553_v62  ;;  %v2206_v19 = vld [vmem:[%s4759_s0 + $0x19a] sm:$0x10]   ;;  %v623_v27 = vsel %vm99_vm2, %v2205_v18, %v619_v22  ;;  %v2223_v47 = vld [vmem:[%s4759_s0 + $0x181] sm:$0x10]  }
  0x27   :  { %500 = vrot.lane.b32.xlu1 %v499_v50, %s2574_s10  ;;  %v2190_v58 = vld [vmem:[%s4759_s0 + $0x1d0] sm:$0x40]   ;;  %v561_v9 = vsel %vm107_vm4, %v2189_v55, %v557_v4  ;;  %v2207_v23 = vld [vmem:[%s4759_s0 + $0x1b9] sm:$0x20]   ;;  %v627_v32 = vsel %vm103_vm3, %v2206_v19, %v623_v27  ;;  %v2224_v52 = vld [vmem:[%s4759_s0 + $0x1a0] sm:$0x20]   ;;  %v692_v55 = vsel %vm99_vm2, %v2222_v46, %v688_v51 }
  0x28   :  { %v2175_v59 = vld [vmem:[%s4759_s0 + $0x16] sm:$0x1]   ;;  %v565_v14 = vsel %vm111_vm5, %v2190_v58, %v561_v9  ;;  %v2208_v24 = vld [vmem:[%s4759_s0 + $0x1d8] sm:$0x40]   ;;  %v631_v37 = vsel %vm107_vm4, %v2207_v23, %v627_v32  ;;  %v2225_v53 = vld [vmem:[%s4759_s0 + $0x1bf] sm:$0x40]  }
  0x29   :  { %v2176_v60 = vld [vmem:[%s4759_s0 + $0x35] sm:$0x2]   ;;  %v2193_v25 = vld [vmem:[%s4759_s0 + $0x1e] sm:$0x1]   ;;  %v635_v42 = vsel %vm111_vm5, %v2208_v24, %v631_v37  ;;  %v2211_v56 = vld [vmem:[%s4759_s0 + $0x5] sm:$0x1]  }
  0x2a   :  { %v510_v63 = vsel %vm91_vm0, %v2176_v60, %v2175_v59  ;;  %v2177_v0 = vld [vmem:[%s4759_s0 + $0x54] sm:$0x4]   ;;  %465 = vrot.lane.b32.xlu0 %v464_v3, %s2574_s10  ;;  %v2194_v28 = vld [vmem:[%s4759_s0 + $0x3d] sm:$0x2]   ;;  %v2212_v57 = vld [vmem:[%s4759_s0 + $0x24] sm:$0x2]   ;;  %v696_v60 = vsel %vm103_vm3, %v2223_v47, %v692_v55 }
  0x2b   :  { %v2178_v1 = vld [vmem:[%s4759_s0 + $0x73] sm:$0x8]   ;;  %v514_v6 = vsel %vm95_vm1, %v2177_v0, %v510_v63  ;;  %v2195_v29 = vld [vmem:[%s4759_s0 + $0x5c] sm:$0x4]   ;;  %v580_v34 = vsel %vm91_vm0, %v2194_v28, %v2193_v25  ;;  %v2213_v58 = vld [vmem:[%s4759_s0 + $0x43] sm:$0x4]   ;;  %v650_v62 = vsel %vm91_vm0, %v2212_v57, %v2211_v56 }
  0x2c   :  { %v2179_v2 = vld [vmem:[%s4759_s0 + $0x92] sm:$0x10]   ;;  %v518_v10 = vsel %vm99_vm2, %v2178_v1, %v514_v6  ;;  %v2196_v30 = vld [vmem:[%s4759_s0 + $0x7b] sm:$0x8]   ;;  %v584_v38 = vsel %vm95_vm1, %v2195_v29, %v580_v34  ;;  %v2226_v61 = vld [vmem:[%s4759_s0 + $0x1de] sm:$0x80]   ;;  %v654_v3 = vsel %vm95_vm1, %v2213_v58, %v650_v62 }
  0x2d   :  { %v2191_v5 = vld [vmem:[%s4759_s0 + $0x1ef] sm:$0x80]   ;;  %v522_v15 = vsel %vm103_vm3, %v2179_v2, %v518_v10  ;;  %v2209_v33 = vld [vmem:[%s4759_s0 + $0x1f7] sm:$0x80]   ;;  %v588_v43 = vsel %vm99_vm2, %v2196_v30, %v584_v38  ;;  %v2214_v63 = vld [vmem:[%s4759_s0 + $0x62] sm:$0x8]   ;;  %v700_v2 = vsel %vm107_vm4, %v2224_v52, %v696_v60 }
  0x2e   :  { %v2180_v7 = vld [vmem:[%s4759_s0 + $0xb1] sm:$0x20]   ;;  %v569_v20 = vsel %vm115_vm6, %v2191_v5, %v565_v14  ;;  %v2197_v35 = vld [vmem:[%s4759_s0 + $0x9a] sm:$0x10]   ;;  %v639_v48 = vsel %vm115_vm6, %v2209_v33, %v635_v42  ;;  %v2215_v0 = vld [vmem:[%s4759_s0 + $0x81] sm:$0x10]  }
  0x2f   :  { %v2181_v8 = vld [vmem:[%s4759_s0 + $0xd0] sm:$0x40]   ;;  %v526_v21 = vsel %vm107_vm4, %v2180_v7, %v522_v15  ;;  %570 = vrot.lane.b32.xlu1 %v569_v20, %s2574_s10  ;;  %v2198_v36 = vld [vmem:[%s4759_s0 + $0xb9] sm:$0x20]   ;;  %v592_v49 = vsel %vm103_vm3, %v2197_v35, %v588_v43  ;;  %v2216_v4 = vld [vmem:[%s4759_s0 + $0xa0] sm:$0x20]   ;;  %v704_v7 = vsel %vm111_vm5, %v2225_v53, %v700_v2 }
  0x30   :  { %v2182_v16 = vld [vmem:[%s4759_s0 + $0xef] sm:$0x80]   ;;  %v530_v26 = vsel %vm111_vm5, %v2181_v8, %v526_v21  ;;  %v2199_v39 = vld [vmem:[%s4759_s0 + $0xd8] sm:$0x40]   ;;  %v596_v54 = vsel %vm107_vm4, %v2198_v36, %v592_v49  ;;  %v2217_v5 = vld [vmem:[%s4759_s0 + $0xbf] sm:$0x40]   ;;  %v658_v8 = vsel %vm99_vm2, %v2214_v63, %v654_v3  ;;  %v708_v12 = vsel %vm115_vm6, %v2226_v61, %v704_v7 }
  0x31   :  { %v534_v31 = vsel %vm115_vm6, %v2182_v16, %v530_v26  ;;  %v2200_v50 = vld [vmem:[%s4759_s0 + $0xf7] sm:$0x80]   ;;  %v600_v59 = vsel %vm111_vm5, %v2199_v39, %v596_v54  ;;  %v2237_v6 = vld [vmem:[%s4759_s0 + $0x10d] sm:$0x1]   ;;  %v662_v13 = vsel %vm103_vm3, %v2215_v0, %v658_v8  ;;  %v2218_v14 = vld [vmem:[%s4759_s0 + $0xde] sm:$0x80]  }
  0x32   :  { %535 = vrot.lane.b32.xlu0 %v534_v31, %s2574_s10  ;;  %v604_v1 = vsel %vm115_vm6, %v2200_v50, %v600_v59  ;;  %v2238_v9 = vld [vmem:[%s4759_s0 + $0x12c] sm:$0x2]   ;;  %v666_v18 = vsel %vm107_vm4, %v2216_v4, %v662_v13  ;;  %v2255_v37 = vld [vmem:[%s4759_s0 + $0x115] sm:$0x1]   ;;  %v2273_v2 = vld [vmem:[%s4759_s0 + $0x11d] sm:$0x1]  }
  0x33   :  { %640 = vrot.lane.b32.xlu1 %v639_v48, %s2574_s10  ;;  %v2239_v10 = vld [vmem:[%s4759_s0 + $0x14b] sm:$0x4]   ;;  %v754_v15 = vsel %vm91_vm0, %v2238_v9, %v2237_v6  ;;  %v670_v23 = vsel %vm111_vm5, %v2217_v5, %v666_v18  ;;  %v2256_v38 = vld [vmem:[%s4759_s0 + $0x134] sm:$0x2]   ;;  %v2274_v3 = vld [vmem:[%s4759_s0 + $0x13c] sm:$0x2]  }
  0x34   :  { %v2240_v11 = vld [vmem:[%s4759_s0 + $0x16a] sm:$0x8]   ;;  %v758_v19 = vsel %vm95_vm1, %v2239_v10, %v754_v15  ;;  %v674_v29 = vsel %vm115_vm6, %v2218_v14, %v670_v23  ;;  %v2257_v39 = vld [vmem:[%s4759_s0 + $0x153] sm:$0x4]   ;;  %v824_v43 = vsel %vm91_vm0, %v2256_v38, %v2255_v37  ;;  %v894_v6 = vsel %vm91_vm0, %v2274_v3, %v2273_v2  ;;  %v2275_v7 = vld [vmem:[%s4759_s0 + $0x15b] sm:$0x4]  }
  0x35   :  { %v2241_v16 = vld [vmem:[%s4759_s0 + $0x189] sm:$0x10]   ;;  %v762_v24 = vsel %vm99_vm2, %v2240_v11, %v758_v19  ;;  %v2258_v44 = vld [vmem:[%s4759_s0 + $0x172] sm:$0x8]   ;;  %v828_v48 = vsel %vm95_vm1, %v2257_v39, %v824_v43  ;;  %v2276_v8 = vld [vmem:[%s4759_s0 + $0x17a] sm:$0x8]   ;;  %v898_v13 = vsel %vm95_vm1, %v2275_v7, %v894_v6 }
  0x36   :  { %605 = vrot.lane.b32.xlu0 %v604_v1, %s2574_s10  ;;  %v2242_v17 = vld [vmem:[%s4759_s0 + $0x1a8] sm:$0x20]   ;;  %v766_v30 = vsel %vm103_vm3, %v2241_v16, %v762_v24  ;;  %v2259_v45 = vld [vmem:[%s4759_s0 + $0x191] sm:$0x10]   ;;  %v832_v53 = vsel %vm99_vm2, %v2258_v44, %v828_v48  ;;  %v2277_v9 = vld [vmem:[%s4759_s0 + $0x199] sm:$0x10]  }
  0x37   :  { %709 = vrot.lane.b32.xlu1 %v708_v12, %s2575_s23  ;;  %v2243_v20 = vld [vmem:[%s4759_s0 + $0x1c7] sm:$0x40]   ;;  %v770_v35 = vsel %vm107_vm4, %v2242_v17, %v766_v30  ;;  %v2260_v49 = vld [vmem:[%s4759_s0 + $0x1b0] sm:$0x20]   ;;  %v836_v58 = vsel %vm103_vm3, %v2259_v45, %v832_v53  ;;  %v2278_v14 = vld [vmem:[%s4759_s0 + $0x1b8] sm:$0x20]   ;;  %v902_v17 = vsel %vm99_vm2, %v2276_v8, %v898_v13 }
  0x38   :  { %v2228_v21 = vld [vmem:[%s4759_s0 + $0xd] sm:$0x1]   ;;  %v774_v40 = vsel %vm111_vm5, %v2243_v20, %v770_v35  ;;  %v2261_v50 = vld [vmem:[%s4759_s0 + $0x1cf] sm:$0x40]   ;;  %v840_v63 = vsel %vm107_vm4, %v2260_v49, %v836_v58  ;;  %v2279_v15 = vld [vmem:[%s4759_s0 + $0x1d7] sm:$0x40]  }
  0x39   :  { %v2229_v22 = vld [vmem:[%s4759_s0 + $0x2c] sm:$0x2]   ;;  %v2246_v51 = vld [vmem:[%s4759_s0 + $0x15] sm:$0x1]   ;;  %v844_v4 = vsel %vm111_vm5, %v2261_v50, %v840_v63  ;;  %v2264_v18 = vld [vmem:[%s4759_s0 + $0x1d] sm:$0x1]  }
  0x3a   :  { %v719_v25 = vsel %vm91_vm0, %v2229_v22, %v2228_v21  ;;  %v2230_v26 = vld [vmem:[%s4759_s0 + $0x4b] sm:$0x4]   ;;  %675 = vrot.lane.b32.xlu0 %v674_v29, %s2575_s23  ;;  %v2247_v54 = vld [vmem:[%s4759_s0 + $0x34] sm:$0x2]   ;;  %v2265_v19 = vld [vmem:[%s4759_s0 + $0x3c] sm:$0x2]   ;;  %v906_v22 = vsel %vm103_vm3, %v2277_v9, %v902_v17 }
  0x3b   :  { %v2231_v27 = vld [vmem:[%s4759_s0 + $0x6a] sm:$0x8]   ;;  %v723_v32 = vsel %vm95_vm1, %v2230_v26, %v719_v25  ;;  %v2248_v55 = vld [vmem:[%s4759_s0 + $0x53] sm:$0x4]   ;;  %v789_v60 = vsel %vm91_vm0, %v2247_v54, %v2246_v51  ;;  %v2266_v20 = vld [vmem:[%s4759_s0 + $0x5b] sm:$0x4]   ;;  %v859_v24 = vsel %vm91_vm0, %v2265_v19, %v2264_v18 }
  0x3c   :  { %v2232_v28 = vld [vmem:[%s4759_s0 + $0x89] sm:$0x10]   ;;  %v727_v36 = vsel %vm99_vm2, %v2231_v27, %v723_v32  ;;  %v2249_v56 = vld [vmem:[%s4759_s0 + $0x72] sm:$0x8]   ;;  %v793_v0 = vsel %vm95_vm1, %v2248_v55, %v789_v60  ;;  %v2280_v23 = vld [vmem:[%s4759_s0 + $0x1f6] sm:$0x80]   ;;  %v863_v29 = vsel %vm95_vm1, %v2266_v20, %v859_v24 }
  0x3d   :  { %v2244_v31 = vld [vmem:[%s4759_s0 + $0x1e6] sm:$0x80]   ;;  %v731_v41 = vsel %vm103_vm3, %v2232_v28, %v727_v36  ;;  %v2262_v59 = vld [vmem:[%s4759_s0 + $0x1ee] sm:$0x80]   ;;  %v797_v5 = vsel %vm99_vm2, %v2249_v56, %v793_v0  ;;  %v2267_v25 = vld [vmem:[%s4759_s0 + $0x7a] sm:$0x8]   ;;  %v910_v28 = vsel %vm107_vm4, %v2278_v14, %v906_v22 }
  0x3e   :  { %v2233_v33 = vld [vmem:[%s4759_s0 + $0xa8] sm:$0x20]   ;;  %v778_v46 = vsel %vm115_vm6, %v2244_v31, %v774_v40  ;;  %v2250_v61 = vld [vmem:[%s4759_s0 + $0x91] sm:$0x10]   ;;  %v848_v10 = vsel %vm115_vm6, %v2262_v59, %v844_v4  ;;  %v2268_v26 = vld [vmem:[%s4759_s0 + $0x99] sm:$0x10]  }
  0x3f   :  { %v2234_v34 = vld [vmem:[%s4759_s0 + $0xc7] sm:$0x40]   ;;  %v735_v47 = vsel %vm107_vm4, %v2233_v33, %v731_v41  ;;  %779 = vrot.lane.b32.xlu1 %v778_v46, %s2575_s23  ;;  %v2251_v62 = vld [vmem:[%s4759_s0 + $0xb0] sm:$0x20]   ;;  %v801_v11 = vsel %vm103_vm3, %v2250_v61, %v797_v5  ;;  %v2269_v30 = vld [vmem:[%s4759_s0 + $0xb8] sm:$0x20]   ;;  %v914_v33 = vsel %vm111_vm5, %v2279_v15, %v910_v28 }
  0x40   :  { %v2235_v42 = vld [vmem:[%s4759_s0 + $0xe6] sm:$0x80]   ;;  %v739_v52 = vsel %vm111_vm5, %v2234_v34, %v735_v47  ;;  %v2252_v1 = vld [vmem:[%s4759_s0 + $0xcf] sm:$0x40]   ;;  %v805_v16 = vsel %vm107_vm4, %v2251_v62, %v801_v11  ;;  %v2270_v31 = vld [vmem:[%s4759_s0 + $0xd7] sm:$0x40]   ;;  %v867_v34 = vsel %vm99_vm2, %v2267_v25, %v863_v29  ;;  %v918_v38 = vsel %vm115_vm6, %v2280_v23, %v914_v33 }
  0x41   :  { %v743_v57 = vsel %vm115_vm6, %v2235_v42, %v739_v52  ;;  %v2253_v12 = vld [vmem:[%s4759_s0 + $0xee] sm:$0x80]   ;;  %v809_v21 = vsel %vm111_vm5, %v2252_v1, %v805_v16  ;;  %v2271_v32 = vld [vmem:[%s4759_s0 + $0xf6] sm:$0x80]   ;;  %v2290_v35 = vld [vmem:[%s4759_s0 + $0x104] sm:$0x1]   ;;  %v871_v39 = vsel %vm103_vm3, %v2268_v26, %v867_v34 }
  0x42   :  { %744 = vrot.lane.b32.xlu0 %v743_v57, %s2575_s23  ;;  %v813_v27 = vsel %vm115_vm6, %v2253_v12, %v809_v21  ;;  %v2291_v36 = vld [vmem:[%s4759_s0 + $0x123] sm:$0x2]   ;;  %v875_v43 = vsel %vm107_vm4, %v2269_v30, %v871_v39  ;;  %v2308_v62 = vld [vmem:[%s4759_s0 + $0x10c] sm:$0x1]   ;;  %s2576_s13 = smov 64   ;;  %s2577_s27 = smov 48  }
  0x43   :  { %849 = vrot.lane.b32.xlu1 %v848_v10, %s2575_s23  ;;  %v2292_v37 = vld [vmem:[%s4759_s0 + $0x142] sm:$0x4]   ;;  %v963_v40 = vsel %vm91_vm0, %v2291_v36, %v2290_v35  ;;  %v879_v48 = vsel %vm111_vm5, %v2270_v31, %v875_v43  ;;  %v2309_v63 = vld [vmem:[%s4759_s0 + $0x12b] sm:$0x2]   ;;  %v2326_v28 = vld [vmem:[%s4759_s0 + $0x114] sm:$0x1]  }
  0x44   :  { %v2293_v41 = vld [vmem:[%s4759_s0 + $0x161] sm:$0x8]   ;;  %v967_v44 = vsel %vm95_vm1, %v2292_v37, %v963_v40  ;;  %v883_v53 = vsel %vm115_vm6, %v2271_v32, %v879_v48  ;;  %v1033_v2 = vsel %vm91_vm0, %v2309_v63, %v2308_v62  ;;  %v2310_v3 = vld [vmem:[%s4759_s0 + $0x14a] sm:$0x4]   ;;  %v2327_v31 = vld [vmem:[%s4759_s0 + $0x133] sm:$0x2]  }
  0x45   :  { %v2294_v42 = vld [vmem:[%s4759_s0 + $0x180] sm:$0x10]   ;;  %v971_v49 = vsel %vm99_vm2, %v2293_v41, %v967_v44  ;;  %v2311_v4 = vld [vmem:[%s4759_s0 + $0x169] sm:$0x8]   ;;  %v1037_v9 = vsel %vm95_vm1, %v2310_v3, %v1033_v2  ;;  %v2328_v32 = vld [vmem:[%s4759_s0 + $0x152] sm:$0x4]   ;;  %v1103_v37 = vsel %vm91_vm0, %v2327_v31, %v2326_v28 }
  0x46   :  { %814 = vrot.lane.b32.xlu0 %v813_v27, %s2575_s23  ;;  %v2295_v45 = vld [vmem:[%s4759_s0 + $0x19f] sm:$0x20]   ;;  %v975_v54 = vsel %vm103_vm3, %v2294_v42, %v971_v49  ;;  %v2312_v5 = vld [vmem:[%s4759_s0 + $0x188] sm:$0x10]   ;;  %v1041_v13 = vsel %vm99_vm2, %v2311_v4, %v1037_v9  ;;  %v2329_v33 = vld [vmem:[%s4759_s0 + $0x171] sm:$0x8]   ;;  %v1107_v41 = vsel %vm95_vm1, %v2328_v32, %v1103_v37 }
  0x47   :  { %919 = vrot.lane.b32.xlu1 %v918_v38, %s2575_s23  ;;  %v2296_v46 = vld [vmem:[%s4759_s0 + $0x1be] sm:$0x40]   ;;  %v979_v59 = vsel %vm107_vm4, %v2295_v45, %v975_v54  ;;  %v2313_v10 = vld [vmem:[%s4759_s0 + $0x1a7] sm:$0x20]   ;;  %v1045_v18 = vsel %vm103_vm3, %v2312_v5, %v1041_v13  ;;  %v2330_v38 = vld [vmem:[%s4759_s0 + $0x190] sm:$0x10]  }
  0x48   :  { %v2282_v47 = vld [vmem:[%s4759_s0 + $0x4] sm:$0x1]   ;;  %v983_v0 = vsel %vm111_vm5, %v2296_v46, %v979_v59  ;;  %v2314_v11 = vld [vmem:[%s4759_s0 + $0x1c6] sm:$0x40]   ;;  %v1049_v24 = vsel %vm107_vm4, %v2313_v10, %v1045_v18  ;;  %v2331_v39 = vld [vmem:[%s4759_s0 + $0x1af] sm:$0x20]   ;;  %v1111_v46 = vsel %vm99_vm2, %v2329_v33, %v1107_v41 }
  0x49   :  { %v2283_v50 = vld [vmem:[%s4759_s0 + $0x23] sm:$0x2]   ;;  %v2299_v14 = vld [vmem:[%s4759_s0 + $0xc] sm:$0x1]   ;;  %v1053_v29 = vsel %vm111_vm5, %v2314_v11, %v1049_v24  ;;  %v2332_v42 = vld [vmem:[%s4759_s0 + $0x1ce] sm:$0x40]  }
  0x4a   :  { %v2284_v51 = vld [vmem:[%s4759_s0 + $0x42] sm:$0x4]   ;;  %v929_v56 = vsel %vm91_vm0, %v2283_v50, %v2282_v47  ;;  %884 = vrot.lane.b32.xlu0 %v883_v53, %s2575_s23  ;;  %v2300_v15 = vld [vmem:[%s4759_s0 + $0x2b] sm:$0x2]   ;;  %v2317_v43 = vld [vmem:[%s4759_s0 + $0x14] sm:$0x1]  }
  0x4b   :  { %v2285_v52 = vld [vmem:[%s4759_s0 + $0x61] sm:$0x8]   ;;  %v933_v60 = vsel %vm95_vm1, %v2284_v51, %v929_v56  ;;  %v2301_v16 = vld [vmem:[%s4759_s0 + $0x4a] sm:$0x4]   ;;  %v998_v20 = vsel %vm91_vm0, %v2300_v15, %v2299_v14  ;;  %v2318_v44 = vld [vmem:[%s4759_s0 + $0x33] sm:$0x2]  }
  0x4c   :  { %v2297_v55 = vld [vmem:[%s4759_s0 + $0x1dd] sm:$0x80]   ;;  %v937_v1 = vsel %vm99_vm2, %v2285_v52, %v933_v60  ;;  %v2315_v19 = vld [vmem:[%s4759_s0 + $0x1e5] sm:$0x80]   ;;  %v1002_v25 = vsel %vm95_vm1, %v2301_v16, %v998_v20  ;;  %v1068_v47 = vsel %vm91_vm0, %v2318_v44, %v2317_v43  ;;  %v2319_v48 = vld [vmem:[%s4759_s0 + $0x52] sm:$0x4]   ;;  %v1115_v52 = vsel %vm103_vm3, %v2330_v38, %v1111_v46 }
  0x4d   :  { %v2286_v57 = vld [vmem:[%s4759_s0 + $0x80] sm:$0x10]   ;;  %v987_v6 = vsel %vm115_vm6, %v2297_v55, %v983_v0  ;;  %v2302_v21 = vld [vmem:[%s4759_s0 + $0x69] sm:$0x8]   ;;  %v1057_v34 = vsel %vm115_vm6, %v2315_v19, %v1053_v29  ;;  %v2320_v49 = vld [vmem:[%s4759_s0 + $0x71] sm:$0x8]   ;;  %v1072_v54 = vsel %vm95_vm1, %v2319_v48, %v1068_v47 }
  0x4e   :  { %v2287_v58 = vld [vmem:[%s4759_s0 + $0x9f] sm:$0x20]   ;;  %v941_v7 = vsel %vm103_vm3, %v2286_v57, %v937_v1  ;;  %988 = vrot.lane.b32.xlu1 %v987_v6, %s2576_s13  ;;  %v2303_v22 = vld [vmem:[%s4759_s0 + $0x88] sm:$0x10]   ;;  %v1006_v30 = vsel %vm99_vm2, %v2302_v21, %v1002_v25  ;;  %v2321_v50 = vld [vmem:[%s4759_s0 + $0x90] sm:$0x10]   ;;  %v1119_v57 = vsel %vm107_vm4, %v2331_v39, %v1115_v52 }
  0x4f   :  { %v2288_v61 = vld [vmem:[%s4759_s0 + $0xbe] sm:$0x40]   ;;  %v945_v12 = vsel %vm107_vm4, %v2287_v58, %v941_v7  ;;  %v2304_v26 = vld [vmem:[%s4759_s0 + $0xa7] sm:$0x20]   ;;  %v1010_v35 = vsel %vm103_vm3, %v2303_v22, %v1006_v30  ;;  %v2333_v53 = vld [vmem:[%s4759_s0 + $0x1ed] sm:$0x80]   ;;  %v1076_v58 = vsel %vm99_vm2, %v2320_v49, %v1072_v54  ;;  %v1123_v62 = vsel %vm111_vm5, %v2332_v42, %v1119_v57 }
  0x50   :  { %v2289_v8 = vld [vmem:[%s4759_s0 + $0xdd] sm:$0x80]   ;;  %v949_v17 = vsel %vm111_vm5, %v2288_v61, %v945_v12  ;;  %v2305_v27 = vld [vmem:[%s4759_s0 + $0xc6] sm:$0x40]   ;;  %v1014_v40 = vsel %vm107_vm4, %v2304_v26, %v1010_v35  ;;  %v2322_v55 = vld [vmem:[%s4759_s0 + $0xaf] sm:$0x20]   ;;  %v1080_v63 = vsel %vm103_vm3, %v2321_v50, %v1076_v58  ;;  %v1127_v4 = vsel %vm115_vm6, %v2333_v53, %v1123_v62 }
  0x51   :  { %v953_v23 = vsel %vm115_vm6, %v2289_v8, %v949_v17  ;;  %v2306_v36 = vld [vmem:[%s4759_s0 + $0xe5] sm:$0x80]   ;;  %v1018_v45 = vsel %vm111_vm5, %v2305_v27, %v1014_v40  ;;  %v2323_v56 = vld [vmem:[%s4759_s0 + $0xce] sm:$0x40]   ;;  %v2344_v59 = vld [vmem:[%s4759_s0 + $0x11c] sm:$0x1]   ;;  %v1084_v5 = vsel %vm107_vm4, %v2322_v55, %v1080_v63 }
  0x52   :  { %954 = vrot.lane.b32.xlu0 %v953_v23, %s2576_s13  ;;  %1058 = vrot.lane.b32.xlu1 %v1057_v34, %s2576_s13  ;;  %v1022_v51 = vsel %vm115_vm6, %v2306_v36, %v1018_v45  ;;  %v2345_v60 = vld [vmem:[%s4759_s0 + $0x13b] sm:$0x2]   ;;  %v2324_v0 = vld [vmem:[%s4759_s0 + $0xed] sm:$0x80]   ;;  %v1088_v10 = vsel %vm111_vm5, %v2323_v56, %v1084_v5  ;;  %s2578_s16 = smov 32   ;;  %s2579_s30 = smov 16  }
  0x53   :  { %v2346_v61 = vld [vmem:[%s4759_s0 + $0x15a] sm:$0x4]   ;;  %v1173_v1 = vsel %vm91_vm0, %v2345_v60, %v2344_v59  ;;  %v1092_v15 = vsel %vm115_vm6, %v2324_v0, %v1088_v10  ;;  %v2361_v24 = vld [vmem:[%s4759_s0 + $0x103] sm:$0x1]   ;;  %v2379_v54 = vld [vmem:[%s4759_s0 + $0x10b] sm:$0x1]  }
  0x54   :  { %v2347_v2 = vld [vmem:[%s4759_s0 + $0x179] sm:$0x8]   ;;  %v1177_v6 = vsel %vm95_vm1, %v2346_v61, %v1173_v1  ;;  %v2362_v25 = vld [vmem:[%s4759_s0 + $0x122] sm:$0x2]   ;;  %v2380_v57 = vld [vmem:[%s4759_s0 + $0x12a] sm:$0x2]  }
  0x55   :  { %v2348_v3 = vld [vmem:[%s4759_s0 + $0x198] sm:$0x10]   ;;  %v1181_v11 = vsel %vm99_vm2, %v2347_v2, %v1177_v6  ;;  %v1242_v28 = vsel %vm91_vm0, %v2362_v25, %v2361_v24  ;;  %v2363_v29 = vld [vmem:[%s4759_s0 + $0x141] sm:$0x4]   ;;  %v2381_v58 = vld [vmem:[%s4759_s0 + $0x149] sm:$0x4]   ;;  %v1312_v63 = vsel %vm91_vm0, %v2380_v57, %v2379_v54 }
  0x56   :  { %1023 = vrot.lane.b32.xlu0 %v1022_v51, %s2576_s13  ;;  %v2349_v7 = vld [vmem:[%s4759_s0 + $0x1b7] sm:$0x20]   ;;  %1128 = vrot.lane.b32.xlu1 %v1127_v4, %s2576_s13  ;;  %v1185_v16 = vsel %vm103_vm3, %v2348_v3, %v1181_v11  ;;  %v2364_v30 = vld [vmem:[%s4759_s0 + $0x160] sm:$0x8]   ;;  %v1246_v35 = vsel %vm95_vm1, %v2363_v29, %v1242_v28  ;;  %v1316_v3 = vsel %vm95_vm1, %v2381_v58, %v1312_v63  ;;  %vm4_vm7 = vcmask 1047556  }
  0x57   :  { %v2350_v8 = vld [vmem:[%s4759_s0 + $0x1d6] sm:$0x40]   ;;  %v1189_v21 = vsel %vm107_vm4, %v2349_v7, %v1185_v16  ;;  %v2365_v31 = vld [vmem:[%s4759_s0 + $0x17f] sm:$0x10]   ;;  %v1250_v39 = vsel %vm99_vm2, %v2364_v30, %v1246_v35  ;;  %v2382_v59 = vld [vmem:[%s4759_s0 + $0x168] sm:$0x8]  }
  0x58   :  { %v2335_v9 = vld [vmem:[%s4759_s0 + $0x1c] sm:$0x1]   ;;  %v1193_v26 = vsel %vm111_vm5, %v2350_v8, %v1189_v21  ;;  %v2366_v36 = vld [vmem:[%s4759_s0 + $0x19e] sm:$0x20]   ;;  %v1254_v44 = vsel %vm103_vm3, %v2365_v31, %v1250_v39  ;;  %v2383_v0 = vld [vmem:[%s4759_s0 + $0x187] sm:$0x10]   ;;  %v1320_v8 = vsel %vm99_vm2, %v2382_v59, %v1316_v3 }
  0x59   :  { %v2336_v12 = vld [vmem:[%s4759_s0 + $0x3b] sm:$0x2]   ;;  %v2367_v37 = vld [vmem:[%s4759_s0 + $0x1bd] sm:$0x40]   ;;  %v1258_v50 = vsel %vm107_vm4, %v2366_v36, %v1254_v44  ;;  %v2384_v1 = vld [vmem:[%s4759_s0 + $0x1a6] sm:$0x20]  }
  0x5a   :  { %v2337_v13 = vld [vmem:[%s4759_s0 + $0x5a] sm:$0x4]   ;;  %v1138_v18 = vsel %vm91_vm0, %v2336_v12, %v2335_v9  ;;  %1093 = vrot.lane.b32.xlu0 %v1092_v15, %s2576_s13  ;;  %v2353_v40 = vld [vmem:[%s4759_s0 + $0x3] sm:$0x1]   ;;  %v1262_v55 = vsel %vm111_vm5, %v2367_v37, %v1258_v50  ;;  %v2385_v4 = vld [vmem:[%s4759_s0 + $0x1c5] sm:$0x40]  }
  0x5b   :  { %v2338_v14 = vld [vmem:[%s4759_s0 + $0x79] sm:$0x8]   ;;  %v1142_v22 = vsel %vm95_vm1, %v2337_v13, %v1138_v18  ;;  %v2354_v41 = vld [vmem:[%s4759_s0 + $0x22] sm:$0x2]   ;;  %v2370_v5 = vld [vmem:[%s4759_s0 + $0xb] sm:$0x1]  }
  0x5c   :  { %v2351_v17 = vld [vmem:[%s4759_s0 + $0x1f5] sm:$0x80]   ;;  %v1146_v27 = vsel %vm99_vm2, %v2338_v14, %v1142_v22  ;;  %v2355_v42 = vld [vmem:[%s4759_s0 + $0x41] sm:$0x4]   ;;  %v1208_v46 = vsel %vm91_vm0, %v2354_v41, %v2353_v40  ;;  %v2371_v6 = vld [vmem:[%s4759_s0 + $0x2a] sm:$0x2]   ;;  %v1324_v14 = vsel %vm103_vm3, %v2383_v0, %v1320_v8 }
  0x5d   :  { %v2339_v19 = vld [vmem:[%s4759_s0 + $0x98] sm:$0x10]   ;;  %v1197_v32 = vsel %vm115_vm6, %v2351_v17, %v1193_v26  ;;  %v2368_v45 = vld [vmem:[%s4759_s0 + $0x1dc] sm:$0x80]   ;;  %v1212_v51 = vsel %vm95_vm1, %v2355_v42, %v1208_v46  ;;  %v1277_v9 = vsel %vm91_vm0, %v2371_v6, %v2370_v5  ;;  %v2372_v10 = vld [vmem:[%s4759_s0 + $0x49] sm:$0x4]  }
  0x5e   :  { %v2340_v20 = vld [vmem:[%s4759_s0 + $0xb7] sm:$0x20]   ;;  %v1150_v33 = vsel %vm103_vm3, %v2339_v19, %v1146_v27  ;;  %1198 = vrot.lane.b32.xlu1 %v1197_v32, %s2576_s13  ;;  %v2356_v47 = vld [vmem:[%s4759_s0 + $0x60] sm:$0x8]   ;;  %v1266_v60 = vsel %vm115_vm6, %v2368_v45, %v1262_v55  ;;  %v2373_v11 = vld [vmem:[%s4759_s0 + $0x68] sm:$0x8]   ;;  %v1281_v16 = vsel %vm95_vm1, %v2372_v10, %v1277_v9  ;;  %v1328_v19 = vsel %vm107_vm4, %v2384_v1, %v1324_v14 }
  0x5f   :  { %v2341_v23 = vld [vmem:[%s4759_s0 + $0xd6] sm:$0x40]   ;;  %v1154_v38 = vsel %vm107_vm4, %v2340_v20, %v1150_v33  ;;  %v2357_v48 = vld [vmem:[%s4759_s0 + $0x7f] sm:$0x10]   ;;  %v1216_v56 = vsel %vm99_vm2, %v2356_v47, %v1212_v51  ;;  %v2374_v12 = vld [vmem:[%s4759_s0 + $0x87] sm:$0x10]   ;;  %v1285_v20 = vsel %vm99_vm2, %v2373_v11, %v1281_v16  ;;  %v1332_v24 = vsel %vm111_vm5, %v2385_v4, %v1328_v19 }
  0x60   :  { %v2342_v34 = vld [vmem:[%s4759_s0 + $0xf5] sm:$0x80]   ;;  %v1158_v43 = vsel %vm111_vm5, %v2341_v23, %v1154_v38  ;;  %v2358_v52 = vld [vmem:[%s4759_s0 + $0x9e] sm:$0x20]   ;;  %v1220_v61 = vsel %vm103_vm3, %v2357_v48, %v1216_v56  ;;  %v2386_v15 = vld [vmem:[%s4759_s0 + $0x1e4] sm:$0x80]   ;;  %v1289_v25 = vsel %vm103_vm3, %v2374_v12, %v1285_v20 }
  0x61   :  { %v1162_v49 = vsel %vm115_vm6, %v2342_v34, %v1158_v43  ;;  %v2359_v53 = vld [vmem:[%s4759_s0 + $0xbd] sm:$0x40]   ;;  %v1224_v2 = vsel %vm107_vm4, %v2358_v52, %v1220_v61  ;;  %v2375_v17 = vld [vmem:[%s4759_s0 + $0xa6] sm:$0x20]   ;;  %v2397_v21 = vld [vmem:[%s4759_s0 + $0x113] sm:$0x1]   ;;  %v1336_v30 = vsel %vm115_vm6, %v2386_v15, %v1332_v24 }
  0x62   :  { %1163 = vrot.lane.b32.xlu0 %v1162_v49, %s2576_s13  ;;  %v2360_v62 = vld [vmem:[%s4759_s0 + $0xdc] sm:$0x80]   ;;  %1267 = vrot.lane.b32.xlu1 %v1266_v60, %s2577_s27  ;;  %v1228_v7 = vsel %vm111_vm5, %v2359_v53, %v1224_v2  ;;  %v2376_v18 = vld [vmem:[%s4759_s0 + $0xc5] sm:$0x40]   ;;  %v1293_v31 = vsel %vm107_vm4, %v2375_v17, %v1289_v25  ;;  %vm6_vm8 = vcmask 130048   ;;  %vm119_vm9 = vcmask 1048448  }
  0x63   :  { %v1232_v13 = vsel %vm115_vm6, %v2360_v62, %v1228_v7  ;;  %v2398_v22 = vld [vmem:[%s4759_s0 + $0x132] sm:$0x2]   ;;  %v2377_v26 = vld [vmem:[%s4759_s0 + $0xe4] sm:$0x80]   ;;  %v1297_v36 = vsel %vm111_vm5, %v2376_v18, %v1293_v31  ;;  %v2415_v50 = vld [vmem:[%s4759_s0 + $0x11b] sm:$0x1]  }
  0x64   :  { %v2399_v23 = vld [vmem:[%s4759_s0 + $0x151] sm:$0x4]   ;;  %v1382_v27 = vsel %vm91_vm0, %v2398_v22, %v2397_v21  ;;  %v1301_v41 = vsel %vm115_vm6, %v2377_v26, %v1297_v36  ;;  %v2416_v51 = vld [vmem:[%s4759_s0 + $0x13a] sm:$0x2]   ;;  %v2432_v19 = vld [vmem:[%s4759_s0 + $0x102] sm:$0x1]  }
  0x65   :  { %v2400_v28 = vld [vmem:[%s4759_s0 + $0x170] sm:$0x8]   ;;  %v1386_v32 = vsel %vm95_vm1, %v2399_v23, %v1382_v27  ;;  %v1452_v54 = vsel %vm91_vm0, %v2416_v51, %v2415_v50  ;;  %v2417_v55 = vld [vmem:[%s4759_s0 + $0x159] sm:$0x4]   ;;  %v2433_v20 = vld [vmem:[%s4759_s0 + $0x121] sm:$0x2]  }
  0x66   :  { %1233 = vrot.lane.b32.xlu0 %v1232_v13, %s2577_s27  ;;  %v2401_v29 = vld [vmem:[%s4759_s0 + $0x18f] sm:$0x10]   ;;  %1337 = vrot.lane.b32.xlu1 %v1336_v30, %s2577_s27  ;;  %v1390_v37 = vsel %vm99_vm2, %v2400_v28, %v1386_v32  ;;  %v2418_v56 = vld [vmem:[%s4759_s0 + $0x178] sm:$0x8]   ;;  %v1456_v61 = vsel %vm95_vm1, %v2417_v55, %v1452_v54  ;;  %v1521_v24 = vsel %vm91_vm0, %v2433_v20, %v2432_v19  ;;  %vm398_vm10 = vcmask 917248  }
  0x67   :  { %v2402_v33 = vld [vmem:[%s4759_s0 + $0x1ae] sm:$0x20]   ;;  %v1394_v42 = vsel %vm103_vm3, %v2401_v29, %v1390_v37  ;;  %v2419_v57 = vld [vmem:[%s4759_s0 + $0x197] sm:$0x10]   ;;  %v1460_v1 = vsel %vm99_vm2, %v2418_v56, %v1456_v61  ;;  %v2434_v21 = vld [vmem:[%s4759_s0 + $0x140] sm:$0x4]  }
  0x68   :  { %v2403_v34 = vld [vmem:[%s4759_s0 + $0x1cd] sm:$0x40]   ;;  %v1398_v47 = vsel %vm107_vm4, %v2402_v33, %v1394_v42  ;;  %v2420_v62 = vld [vmem:[%s4759_s0 + $0x1b6] sm:$0x20]   ;;  %v1464_v6 = vsel %vm103_vm3, %v2419_v57, %v1460_v1  ;;  %v2435_v25 = vld [vmem:[%s4759_s0 + $0x15f] sm:$0x8]   ;;  %v1525_v28 = vsel %vm95_vm1, %v2434_v21, %v1521_v24 }
  0x69   :  { %v2388_v35 = vld [vmem:[%s4759_s0 + $0x13] sm:$0x1]   ;;  %v1402_v52 = vsel %vm111_vm5, %v2403_v34, %v1398_v47  ;;  %v2421_v63 = vld [vmem:[%s4759_s0 + $0x1d5] sm:$0x40]   ;;  %v1468_v12 = vsel %vm107_vm4, %v2420_v62, %v1464_v6  ;;  %v2436_v26 = vld [vmem:[%s4759_s0 + $0x17e] sm:$0x10]   ;;  %v1529_v33 = vsel %vm99_vm2, %v2435_v25, %v1525_v28 }
  0x6a   :  { %v2389_v38 = vld [vmem:[%s4759_s0 + $0x32] sm:$0x2]   ;;  %1302 = vrot.lane.b32.xlu0 %v1301_v41, %s2577_s27  ;;  %v2406_v2 = vld [vmem:[%s4759_s0 + $0x1b] sm:$0x1]   ;;  %v1472_v17 = vsel %vm111_vm5, %v2421_v63, %v1468_v12  ;;  %v2437_v29 = vld [vmem:[%s4759_s0 + $0x19d] sm:$0x20]  }
  0x6b   :  { %v2390_v39 = vld [vmem:[%s4759_s0 + $0x51] sm:$0x4]   ;;  %v1347_v44 = vsel %vm91_vm0, %v2389_v38, %v2388_v35  ;;  %v2407_v3 = vld [vmem:[%s4759_s0 + $0x3a] sm:$0x2]   ;;  %v2438_v30 = vld [vmem:[%s4759_s0 + $0x1bc] sm:$0x40]   ;;  %v1533_v38 = vsel %vm103_vm3, %v2436_v26, %v1529_v33 }
  0x6c   :  { %v2391_v40 = vld [vmem:[%s4759_s0 + $0x70] sm:$0x8]   ;;  %v1351_v48 = vsel %vm95_vm1, %v2390_v39, %v1347_v44  ;;  %v2408_v4 = vld [vmem:[%s4759_s0 + $0x59] sm:$0x4]   ;;  %v1417_v8 = vsel %vm91_vm0, %v2407_v3, %v2406_v2  ;;  %v2424_v31 = vld [vmem:[%s4759_s0 + $0x2] sm:$0x1]  }
  0x6d   :  { %v2404_v43 = vld [vmem:[%s4759_s0 + $0x1ec] sm:$0x80]   ;;  %v1355_v53 = vsel %vm99_vm2, %v2391_v40, %v1351_v48  ;;  %v2422_v7 = vld [vmem:[%s4759_s0 + $0x1f4] sm:$0x80]   ;;  %v1421_v13 = vsel %vm95_vm1, %v2408_v4, %v1417_v8  ;;  %v2425_v34 = vld [vmem:[%s4759_s0 + $0x21] sm:$0x2]  }
  0x6e   :  { %v2392_v45 = vld [vmem:[%s4759_s0 + $0x8f] sm:$0x10]   ;;  %v1406_v58 = vsel %vm115_vm6, %v2404_v43, %v1402_v52  ;;  %v2409_v9 = vld [vmem:[%s4759_s0 + $0x78] sm:$0x8]   ;;  %v1476_v22 = vsel %vm115_vm6, %v2422_v7, %v1472_v17  ;;  %v2426_v35 = vld [vmem:[%s4759_s0 + $0x40] sm:$0x4]   ;;  %v1487_v40 = vsel %vm91_vm0, %v2425_v34, %v2424_v31  ;;  %v1537_v43 = vsel %vm107_vm4, %v2437_v29, %v1533_v38 }
  0x6f   :  { %v2393_v46 = vld [vmem:[%s4759_s0 + $0xae] sm:$0x20]   ;;  %v1359_v59 = vsel %vm103_vm3, %v2392_v45, %v1355_v53  ;;  %1407 = vrot.lane.b32.xlu1 %v1406_v58, %s2577_s27  ;;  %v2410_v10 = vld [vmem:[%s4759_s0 + $0x97] sm:$0x10]   ;;  %v1425_v18 = vsel %vm99_vm2, %v2409_v9, %v1421_v13  ;;  %v2427_v36 = vld [vmem:[%s4759_s0 + $0x5f] sm:$0x8]   ;;  %v1491_v44 = vsel %vm95_vm1, %v2426_v35, %v1487_v40  ;;  %v1541_v48 = vsel %vm111_vm5, %v2438_v30, %v1537_v43 }
  0x70   :  { %v2394_v49 = vld [vmem:[%s4759_s0 + $0xcd] sm:$0x40]   ;;  %v1363_v0 = vsel %vm107_vm4, %v2393_v46, %v1359_v59  ;;  %v2411_v14 = vld [vmem:[%s4759_s0 + $0xb6] sm:$0x20]   ;;  %v1429_v23 = vsel %vm103_vm3, %v2410_v10, %v1425_v18  ;;  %v2439_v39 = vld [vmem:[%s4759_s0 + $0x1db] sm:$0x80]  }
  0x71   :  { %v2395_v60 = vld [vmem:[%s4759_s0 + $0xec] sm:$0x80]   ;;  %v1367_v5 = vsel %vm111_vm5, %v2394_v49, %v1363_v0  ;;  %v2412_v15 = vld [vmem:[%s4759_s0 + $0xd5] sm:$0x40]   ;;  %v1433_v27 = vsel %vm107_vm4, %v2411_v14, %v1429_v23  ;;  %v2428_v41 = vld [vmem:[%s4759_s0 + $0x7e] sm:$0x10]   ;;  %v1495_v49 = vsel %vm99_vm2, %v2427_v36, %v1491_v44  ;;  %v1545_v54 = vsel %vm115_vm6, %v2439_v39, %v1541_v48 }
  0x72   :  { %v1371_v11 = vsel %vm115_vm6, %v2395_v60, %v1367_v5  ;;  %v2413_v16 = vld [vmem:[%s4759_s0 + $0xf4] sm:$0x80]   ;;  %v1437_v32 = vsel %vm111_vm5, %v2412_v15, %v1433_v27  ;;  %v2429_v42 = vld [vmem:[%s4759_s0 + $0x9d] sm:$0x20]   ;;  %v2450_v46 = vld [vmem:[%s4759_s0 + $0x10a] sm:$0x1]   ;;  %v1499_v55 = vsel %vm103_vm3, %v2428_v41, %v1495_v49 }
  0x73   :  { %1372 = vrot.lane.b32.xlu0 %v1371_v11, %s2577_s27  ;;  %1477 = vrot.lane.b32.xlu1 %v1476_v22, %s2577_s27  ;;  %v1441_v37 = vsel %vm115_vm6, %v2413_v16, %v1437_v32  ;;  %v2430_v45 = vld [vmem:[%s4759_s0 + $0xbc] sm:$0x40]   ;;  %v2451_v47 = vld [vmem:[%s4759_s0 + $0x129] sm:$0x2]   ;;  %v1503_v60 = vsel %vm107_vm4, %v2429_v42, %v1499_v55  ;;  %vm677_vm11 = vcmask 786048   ;;  %vm956_vm12 = vcmask 654848  }
  0x74   :  { %v1591_v50 = vsel %vm91_vm0, %v2451_v47, %v2450_v46  ;;  %v2452_v51 = vld [vmem:[%s4759_s0 + $0x148] sm:$0x4]   ;;  %v2431_v56 = vld [vmem:[%s4759_s0 + $0xdb] sm:$0x80]   ;;  %v1507_v1 = vsel %vm111_vm5, %v2430_v45, %v1503_v60  ;;  %v2468_v12 = vld [vmem:[%s4759_s0 + $0x112] sm:$0x1]  }
  0x75   :  { %v2453_v52 = vld [vmem:[%s4759_s0 + $0x167] sm:$0x8]   ;;  %v1595_v57 = vsel %vm95_vm1, %v2452_v51, %v1591_v50  ;;  %v1511_v7 = vsel %vm115_vm6, %v2431_v56, %v1507_v1  ;;  %v2469_v15 = vld [vmem:[%s4759_s0 + $0x131] sm:$0x2]   ;;  %v2486_v44 = vld [vmem:[%s4759_s0 + $0x11a] sm:$0x1]  }
  0x76   :  { %v2454_v53 = vld [vmem:[%s4759_s0 + $0x186] sm:$0x10]   ;;  %v1599_v61 = vsel %vm99_vm2, %v2453_v52, %v1595_v57  ;;  %v2470_v16 = vld [vmem:[%s4759_s0 + $0x150] sm:$0x4]   ;;  %v1661_v21 = vsel %vm91_vm0, %v2469_v15, %v2468_v12  ;;  %v2487_v45 = vld [vmem:[%s4759_s0 + $0x139] sm:$0x2]  }
  0x77   :  { %1442 = vrot.lane.b32.xlu0 %v1441_v37, %s2577_s27  ;;  %v2455_v58 = vld [vmem:[%s4759_s0 + $0x1a5] sm:$0x20]   ;;  %1546 = vrot.lane.b32.xlu1 %v1545_v54, %s2578_s16  ;;  %v1603_v2 = vsel %vm103_vm3, %v2454_v53, %v1599_v61  ;;  %v2471_v17 = vld [vmem:[%s4759_s0 + $0x16f] sm:$0x8]   ;;  %v1665_v25 = vsel %vm95_vm1, %v2470_v16, %v1661_v21  ;;  %v1731_v50 = vsel %vm91_vm0, %v2487_v45, %v2486_v44  ;;  %vm1235_vm13 = vcmask 523648  }
  0x78   :  { %v2456_v59 = vld [vmem:[%s4759_s0 + $0x1c4] sm:$0x40]   ;;  %v1607_v8 = vsel %vm107_vm4, %v2455_v58, %v1603_v2  ;;  %v2472_v22 = vld [vmem:[%s4759_s0 + $0x18e] sm:$0x10]   ;;  %v1669_v30 = vsel %vm99_vm2, %v2471_v17, %v1665_v25  ;;  %v2488_v46 = vld [vmem:[%s4759_s0 + $0x158] sm:$0x4]  }
  0x79   :  { %v2441_v62 = vld [vmem:[%s4759_s0 + $0xa] sm:$0x1]   ;;  %v1611_v13 = vsel %vm111_vm5, %v2456_v59, %v1607_v8  ;;  %v2473_v23 = vld [vmem:[%s4759_s0 + $0x1ad] sm:$0x20]   ;;  %v1673_v36 = vsel %vm103_vm3, %v2472_v22, %v1669_v30  ;;  %v2489_v51 = vld [vmem:[%s4759_s0 + $0x177] sm:$0x8]   ;;  %v1735_v56 = vsel %vm95_vm1, %v2488_v46, %v1731_v50 }
  0x7a   :  { %v2442_v63 = vld [vmem:[%s4759_s0 + $0x29] sm:$0x2]   ;;  %v2474_v26 = vld [vmem:[%s4759_s0 + $0x1cc] sm:$0x40]   ;;  %v1677_v42 = vsel %vm107_vm4, %v2473_v23, %v1673_v36  ;;  %v2490_v52 = vld [vmem:[%s4759_s0 + $0x196] sm:$0x10]   ;;  %v1739_v61 = vsel %vm99_vm2, %v2489_v51, %v1735_v56 }
  0x7b   :  { %v2443_v0 = vld [vmem:[%s4759_s0 + $0x48] sm:$0x4]   ;;  %v1556_v4 = vsel %vm91_vm0, %v2442_v63, %v2441_v62  ;;  %1512 = vrot.lane.b32.xlu0 %v1511_v7, %s2578_s16  ;;  %v2459_v27 = vld [vmem:[%s4759_s0 + $0x12] sm:$0x1]   ;;  %v1681_v47 = vsel %vm111_vm5, %v2474_v26, %v1677_v42  ;;  %v2491_v57 = vld [vmem:[%s4759_s0 + $0x1b5] sm:$0x20]   ;;  %v1743_v2 = vsel %vm103_vm3, %v2490_v52, %v1739_v61 }
  0x7c   :  { %v2457_v3 = vld [vmem:[%s4759_s0 + $0x1e3] sm:$0x80]   ;;  %v1560_v9 = vsel %vm95_vm1, %v2443_v0, %v1556_v4  ;;  %v2460_v28 = vld [vmem:[%s4759_s0 + $0x31] sm:$0x2]   ;;  %v4048_v41 = vpop.permute.xlu1 %186   ;;  %v2492_v58 = vld [vmem:[%s4759_s0 + $0x1d4] sm:$0x40]   ;;  %v1747_v8 = vsel %vm107_vm4, %v2491_v57, %v1743_v2 }
  0x7d   :  { %v2444_v5 = vld [vmem:[%s4759_s0 + $0x67] sm:$0x8]   ;;  %v1615_v18 = vsel %vm115_vm6, %v2457_v3, %v1611_v13  ;;  %v1626_v31 = vsel %vm91_vm0, %v2460_v28, %v2459_v27  ;;  %v2461_v32 = vld [vmem:[%s4759_s0 + $0x50] sm:$0x4]   ;;  %v4074_v53 = vpop.permute.xlu0 %117   ;;  %v2477_v59 = vld [vmem:[%s4759_s0 + $0x1a] sm:$0x1]   ;;  %v1751_v13 = vsel %vm111_vm5, %v2492_v58, %v1747_v8 }
  0x7e   :  { %v2445_v6 = vld [vmem:[%s4759_s0 + $0x86] sm:$0x10]   ;;  %v1564_v14 = vsel %vm99_vm2, %v2444_v5, %v1560_v9  ;;  %1616 = vrot.lane.b32.xlu1 %v1615_v18, %s2578_s16  ;;  %v2462_v33 = vld [vmem:[%s4759_s0 + $0x6f] sm:$0x8]   ;;  %v1630_v38 = vsel %vm95_vm1, %v2461_v32, %v1626_v31  ;;  %v2478_v62 = vld [vmem:[%s4759_s0 + $0x39] sm:$0x2]  }
  0x7f   :  { %v2446_v10 = vld [vmem:[%s4759_s0 + $0xa5] sm:$0x20]   ;;  %v1568_v19 = vsel %vm103_vm3, %v2445_v6, %v1564_v14  ;;  %v2463_v34 = vld [vmem:[%s4759_s0 + $0x8e] sm:$0x10]   ;;  %v1634_v43 = vsel %vm99_vm2, %v2462_v33, %v1630_v38  ;;  %v2479_v63 = vld [vmem:[%s4759_s0 + $0x58] sm:$0x4]   ;;  %v1696_v4 = vsel %vm91_vm0, %v2478_v62, %v2477_v59 }
  0x80   :  { %v2447_v11 = vld [vmem:[%s4759_s0 + $0xc4] sm:$0x40]   ;;  %v1572_v24 = vsel %vm107_vm4, %v2446_v10, %v1568_v19  ;;  %v2475_v37 = vld [vmem:[%s4759_s0 + $0x1eb] sm:$0x80]   ;;  %v1638_v48 = vsel %vm103_vm3, %v2463_v34, %v1634_v43  ;;  %v2480_v0 = vld [vmem:[%s4759_s0 + $0x77] sm:$0x8]   ;;  %v1700_v9 = vsel %vm95_vm1, %v2479_v63, %v1696_v4 }
  0x81   :  { %v2448_v20 = vld [vmem:[%s4759_s0 + $0xe3] sm:$0x80]   ;;  %v1576_v29 = vsel %vm111_vm5, %v2447_v11, %v1572_v24  ;;  %v2464_v39 = vld [vmem:[%s4759_s0 + $0xad] sm:$0x20]   ;;  %v1685_v54 = vsel %vm115_vm6, %v2475_v37, %v1681_v47  ;;  %v2493_v3 = vld [vmem:[%s4759_s0 + $0x1f3] sm:$0x80]   ;;  %v1704_v14 = vsel %vm99_vm2, %v2480_v0, %v1700_v9 }
  0x82   :  { %v1580_v35 = vsel %vm115_vm6, %v2448_v20, %v1576_v29  ;;  %v2465_v40 = vld [vmem:[%s4759_s0 + $0xcc] sm:$0x40]   ;;  %v1642_v55 = vsel %vm107_vm4, %v2464_v39, %v1638_v48  ;;  %1686 = vrot.lane.b32.xlu1 %v1685_v54, %s2578_s16  ;;  %v2481_v5 = vld [vmem:[%s4759_s0 + $0x96] sm:$0x10]   ;;  %v2503_v11 = vld [vmem:[%s4759_s0 + $0x101] sm:$0x1]   ;;  %v1755_v19 = vsel %vm115_vm6, %v2493_v3, %v1751_v13 }
  0x83   :  { %1581 = vrot.lane.b32.xlu0 %v1580_v35, %s2578_s16  ;;  %v2466_v49 = vld [vmem:[%s4759_s0 + $0xeb] sm:$0x80]   ;;  %v1646_v60 = vsel %vm111_vm5, %v2465_v40, %v1642_v55  ;;  %v2482_v6 = vld [vmem:[%s4759_s0 + $0xb5] sm:$0x20]   ;;  %v2504_v12 = vld [vmem:[%s4759_s0 + $0x120] sm:$0x2]   ;;  %v1708_v20 = vsel %vm103_vm3, %v2481_v5, %v1704_v14 }
  0x84   :  { %v1650_v1 = vsel %vm115_vm6, %v2466_v49, %v1646_v60  ;;  %v4112_v7 = vpop.permute.xlu1 %221   ;;  %v2483_v10 = vld [vmem:[%s4759_s0 + $0xd4] sm:$0x40]   ;;  %v1800_v15 = vsel %vm91_vm0, %v2504_v12, %v2503_v11  ;;  %v2505_v16 = vld [vmem:[%s4759_s0 + $0x13f] sm:$0x4]   ;;  %v1712_v26 = vsel %vm107_vm4, %v2482_v6, %v1708_v20  ;;  %v2521_v44 = vld [vmem:[%s4759_s0 + $0x109] sm:$0x1]  }
  0x85   :  { %v2506_v17 = vld [vmem:[%s4759_s0 + $0x15e] sm:$0x8]   ;;  %v2484_v21 = vld [vmem:[%s4759_s0 + $0xf3] sm:$0x80]   ;;  %v1804_v22 = vsel %vm95_vm1, %v2505_v16, %v1800_v15  ;;  %v4150_v25 = vpop.permute.xlu0 %151   ;;  %v1716_v31 = vsel %vm111_vm5, %v2483_v10, %v1712_v26  ;;  %v2522_v47 = vld [vmem:[%s4759_s0 + $0x128] sm:$0x2]  }
  0x86   :  { %v2507_v18 = vld [vmem:[%s4759_s0 + $0x17d] sm:$0x10]   ;;  %1756 = vrot.lane.b32.xlu1 %v1755_v19, %s2578_s16  ;;  %v1808_v27 = vsel %vm99_vm2, %v2506_v17, %v1804_v22  ;;  %v1720_v38 = vsel %vm115_vm6, %v2484_v21, %v1716_v31  ;;  %v2523_v48 = vld [vmem:[%s4759_s0 + $0x147] sm:$0x4]   ;;  %v1870_v54 = vsel %vm91_vm0, %v2522_v47, %v2521_v44  ;;  %v2539_v15 = vld [vmem:[%s4759_s0 + $0x111] sm:$0x1]  }
  0x87   :  { %1651 = vrot.lane.b32.xlu0 %v1650_v1, %s2578_s16  ;;  %v2508_v23 = vld [vmem:[%s4759_s0 + $0x19c] sm:$0x20]   ;;  %v1812_v32 = vsel %vm103_vm3, %v2507_v18, %v1808_v27  ;;  %v2524_v49 = vld [vmem:[%s4759_s0 + $0x166] sm:$0x8]   ;;  %v1874_v59 = vsel %vm95_vm1, %v2523_v48, %v1870_v54  ;;  %v2540_v16 = vld [vmem:[%s4759_s0 + $0x130] sm:$0x2]  }
  0x88   :  { %v2509_v24 = vld [vmem:[%s4759_s0 + $0x1bb] sm:$0x40]   ;;  %v4176_v37 = vpop.permute.xlu1 %291   ;;  %v1816_v39 = vsel %vm107_vm4, %v2508_v23, %v1812_v32  ;;  %v2525_v55 = vld [vmem:[%s4759_s0 + $0x185] sm:$0x10]   ;;  %v1878_v0 = vsel %vm99_vm2, %v2524_v49, %v1874_v59  ;;  %v2541_v17 = vld [vmem:[%s4759_s0 + $0x14f] sm:$0x4]   ;;  %v1940_v21 = vsel %vm91_vm0, %v2540_v16, %v2539_v15 }
  0x89   :  { %v2495_v28 = vld [vmem:[%s4759_s0 + $0x1] sm:$0x1]   ;;  %v1820_v45 = vsel %vm111_vm5, %v2509_v24, %v1816_v39  ;;  %v2526_v56 = vld [vmem:[%s4759_s0 + $0x1a4] sm:$0x20]   ;;  %v4214_v57 = vpop.permute.xlu0 %256   ;;  %v1882_v6 = vsel %vm103_vm3, %v2525_v55, %v1878_v0  ;;  %v2542_v22 = vld [vmem:[%s4759_s0 + $0x16e] sm:$0x8]  }
  0x8a   :  { %v2496_v29 = vld [vmem:[%s4759_s0 + $0x20] sm:$0x2]   ;;  %v2527_v60 = vld [vmem:[%s4759_s0 + $0x1c3] sm:$0x40]   ;;  %v1886_v13 = vsel %vm107_vm4, %v2526_v56, %v1882_v6  ;;  %v2543_v23 = vld [vmem:[%s4759_s0 + $0x18d] sm:$0x10]  }
  0x8b   :  { %v2497_v30 = vld [vmem:[%s4759_s0 + $0x3f] sm:$0x4]   ;;  %v1766_v34 = vsel %vm91_vm0, %v2496_v29, %v2495_v28  ;;  %1721 = vrot.lane.b32.xlu0 %v1720_v38, %s2578_s16  ;;  %v2512_v61 = vld [vmem:[%s4759_s0 + $0x9] sm:$0x1]   ;;  %v1890_v18 = vsel %vm111_vm5, %v2527_v60, %v1886_v13  ;;  %v1944_v28 = vsel %vm95_vm1, %v2541_v17, %v1940_v21  ;;  %v2544_v29 = vld [vmem:[%s4759_s0 + $0x1ac] sm:$0x20]  }
  0x8c   :  { %v2510_v33 = vld [vmem:[%s4759_s0 + $0x1da] sm:$0x80]   ;;  %v1770_v40 = vsel %vm95_vm1, %v2497_v30, %v1766_v34  ;;  %v2513_v62 = vld [vmem:[%s4759_s0 + $0x28] sm:$0x2]   ;;  %v2545_v30 = vld [vmem:[%s4759_s0 + $0x1cb] sm:$0x40]  }
  0x8d   :  { %v2498_v35 = vld [vmem:[%s4759_s0 + $0x5e] sm:$0x8]   ;;  %v1824_v50 = vsel %vm115_vm6, %v2510_v33, %v1820_v45  ;;  %v1835_v1 = vsel %vm91_vm0, %v2513_v62, %v2512_v61  ;;  %v2514_v2 = vld [vmem:[%s4759_s0 + $0x47] sm:$0x4]   ;;  %v2530_v31 = vld [vmem:[%s4759_s0 + $0x11] sm:$0x1]   ;;  %v1948_v33 = vsel %vm99_vm2, %v2542_v22, %v1944_v28 }
  0x8e   :  { %v2499_v36 = vld [vmem:[%s4759_s0 + $0x7d] sm:$0x10]   ;;  %v1774_v46 = vsel %vm99_vm2, %v2498_v35, %v1770_v40  ;;  %1825 = vrot.lane.b32.xlu1 %v1824_v50, %s2579_s30  ;;  %v2515_v3 = vld [vmem:[%s4759_s0 + $0x66] sm:$0x8]   ;;  %v1839_v9 = vsel %vm95_vm1, %v2514_v2, %v1835_v1  ;;  %v2531_v34 = vld [vmem:[%s4759_s0 + $0x30] sm:$0x2]   ;;  %v1952_v39 = vsel %vm103_vm3, %v2543_v23, %v1948_v33 }
  0x8f   :  { %v2500_v42 = vld [vmem:[%s4759_s0 + $0x9c] sm:$0x20]   ;;  %v1778_v51 = vsel %vm103_vm3, %v2499_v36, %v1774_v46  ;;  %v2516_v4 = vld [vmem:[%s4759_s0 + $0x85] sm:$0x10]   ;;  %v1843_v14 = vsel %vm99_vm2, %v2515_v3, %v1839_v9  ;;  %v2532_v35 = vld [vmem:[%s4759_s0 + $0x4f] sm:$0x4]   ;;  %v1956_v46 = vsel %vm107_vm4, %v2544_v29, %v1952_v39 }
  0x90   :  { %v2501_v43 = vld [vmem:[%s4759_s0 + $0xbb] sm:$0x40]   ;;  %v1782_v58 = vsel %vm107_vm4, %v2500_v42, %v1778_v51  ;;  %v2528_v8 = vld [vmem:[%s4759_s0 + $0x1e2] sm:$0x80]   ;;  %v1847_v19 = vsel %vm103_vm3, %v2516_v4, %v1843_v14  ;;  %v2533_v36 = vld [vmem:[%s4759_s0 + $0x6e] sm:$0x8]   ;;  %v1905_v42 = vsel %vm91_vm0, %v2531_v34, %v2530_v31  ;;  %v1960_v51 = vsel %vm111_vm5, %v2545_v30, %v1956_v46 }
  0x91   :  { %v2502_v52 = vld [vmem:[%s4759_s0 + $0xda] sm:$0x80]   ;;  %v1786_v63 = vsel %vm111_vm5, %v2501_v43, %v1782_v58  ;;  %v2517_v10 = vld [vmem:[%s4759_s0 + $0xa4] sm:$0x20]   ;;  %v4252_v12 = vpop.permute.xlu1 %361   ;;  %v1894_v26 = vsel %vm115_vm6, %v2528_v8, %v1890_v18  ;;  %v2546_v40 = vld [vmem:[%s4759_s0 + $0x1ea] sm:$0x80]   ;;  %v1909_v47 = vsel %vm95_vm1, %v2532_v35, %v1905_v42 }
  0x92   :  { %v1790_v5 = vsel %vm115_vm6, %v2502_v52, %v1786_v63  ;;  %v2518_v11 = vld [vmem:[%s4759_s0 + $0xc3] sm:$0x40]   ;;  %v1851_v27 = vsel %vm107_vm4, %v2517_v10, %v1847_v19  ;;  %1895 = vrot.lane.b32.xlu1 %v1894_v26, %s2579_s30  ;;  %v2534_v43 = vld [vmem:[%s4759_s0 + $0x8d] sm:$0x10]   ;;  %v2557_v49 = vld [vmem:[%s4759_s0 + $0x119] sm:$0x1]   ;;  %v1913_v52 = vsel %vm99_vm2, %v2533_v36, %v1909_v47  ;;  %v1964_v59 = vsel %vm115_vm6, %v2546_v40, %v1960_v51 }
  0x93   :  { %1791 = vrot.lane.b32.xlu0 %v1790_v5, %s2579_s30  ;;  %v2519_v20 = vld [vmem:[%s4759_s0 + $0xe2] sm:$0x80]   ;;  %v1855_v32 = vsel %vm111_vm5, %v2518_v11, %v1851_v27  ;;  %v2535_v44 = vld [vmem:[%s4759_s0 + $0xac] sm:$0x20]   ;;  %v2558_v50 = vld [vmem:[%s4759_s0 + $0x138] sm:$0x2]   ;;  %v1917_v60 = vsel %vm103_vm3, %v2534_v43, %v1913_v52 }
  0x94   :  { %v4278_v24 = vpop.permute.xlu0 %326   ;;  %v1859_v38 = vsel %vm115_vm6, %v2519_v20, %v1855_v32  ;;  %v2536_v48 = vld [vmem:[%s4759_s0 + $0xcb] sm:$0x40]   ;;  %v2010_v54 = vsel %vm91_vm0, %v2558_v50, %v2557_v49  ;;  %v2559_v55 = vld [vmem:[%s4759_s0 + $0x157] sm:$0x4]   ;;  %v1921_v2 = vsel %vm107_vm4, %v2535_v44, %v1917_v60  ;;  %vm1514_vm14 = vcmask 392448  }
  0x95   :  { %v4316_v45 = vpop.permute.xlu1 %430   ;;  %v2560_v56 = vld [vmem:[%s4759_s0 + $0x176] sm:$0x8]   ;;  %v2537_v61 = vld [vmem:[%s4759_s0 + $0xea] sm:$0x80]   ;;  %v2014_v62 = vsel %vm95_vm1, %v2559_v55, %v2010_v54  ;;  %v1925_v8 = vsel %vm111_vm5, %v2536_v48, %v1921_v2  ;;  %vm1793_vm15 = vcmask 261248  }
  0x96   :  { %v2561_v58 = vld [vmem:[%s4759_s0 + $0x195] sm:$0x10]   ;;  %1965 = vrot.lane.b32.xlu1 %v1964_v59, %s2579_s30  ;;  %v2018_v3 = vsel %vm99_vm2, %v2560_v56, %v2014_v62  ;;  %v1929_v16 = vsel %vm115_vm6, %v2537_v61, %v1925_v8  ;;  %v2053_v26 = vld [vmem:[%s4759_s0 + $0x100] ss:$8 sm:$0xf]  }
  0x97   :  { %1860 = vrot.lane.b32.xlu0 %v1859_v38, %s2579_s30  ;;  %v2562_v63 = vld [vmem:[%s4759_s0 + $0x1b4] sm:$0x20]   ;;  %v2022_v9 = vsel %vm103_vm3, %v2561_v58, %v2018_v3  ;;  %v2054_v29 = vld [vmem:[%s4759_s0 + $0x100] ss:$8 sm:$0xf0]  }
  0x98   :  { %v2563_v0 = vld [vmem:[%s4759_s0 + $0x1d3] sm:$0x40]   ;;  %v4354_v1 = vpop.permute.xlu0 %396   ;;  %v2026_v17 = vsel %vm107_vm4, %v2562_v63, %v2022_v9  ;;  %v48_v32 = vsel %vm4_vm7, %v2054_v29, %v2053_v26  ;;  %v2057_v33 = vld [vmem:[%s4759_s0 + $0x140] ss:$8 sm:$0xf]  }
  0x99   :  { %v2548_v4 = vld [vmem:[%s4759_s0 + $0x19] sm:$0x1]   ;;  %v4380_v15 = vpop.permute.xlu1 %500   ;;  %v2030_v22 = vsel %vm111_vm5, %v2563_v0, %v2026_v17  ;;  %v2058_v34 = vld [vmem:[%s4759_s0 + $0x140] ss:$8 sm:$0xf0]  }
  0x9a   :  { %v2549_v5 = vld [vmem:[%s4759_s0 + $0x38] sm:$0x2]   ;;  %2055 = vst.msk [vmem:[%s4760_s1 + $0x20] ss:$8 sm:$0xf] %vm6_vm8, %v48_v32   ;;  %v59_v36 = vsel %vm4_vm7, %v2058_v34, %v2057_v33 }
  0x9b   :  { %v2550_v6 = vld [vmem:[%s4759_s0 + $0x57] sm:$0x4]   ;;  %v1975_v11 = vsel %vm91_vm0, %v2549_v5, %v2548_v4  ;;  %1930 = vrot.lane.b32.xlu0 %v1929_v16, %s2579_s30  ;;  %2056 = vst.msk [vmem:[%s4760_s1 + $0x1] ss:$8 sm:$0xf0] %vm6_vm8, %v48_v32  }
  0x9c   :  { %v2564_v10 = vld [vmem:[%s4759_s0 + $0x1f2] sm:$0x80]   ;;  %v1979_v18 = vsel %vm95_vm1, %v2550_v6, %v1975_v11  ;;  %v466_v30 = vpop.permute.xlu0 %465   ;;  %v2061_v38 = vld [vmem:[%s4759_s0 + $0x180] ss:$8 sm:$0xf]  }
  0x9d   :  { %v2551_v13 = vld [vmem:[%s4759_s0 + $0x76] sm:$0x8]   ;;  %v2034_v27 = vsel %vm115_vm6, %v2564_v10, %v2030_v22  ;;  %v2062_v39 = vld [vmem:[%s4759_s0 + $0x180] ss:$8 sm:$0xf0]  }
  0x9e   :  { %v2552_v14 = vld [vmem:[%s4759_s0 + $0x95] sm:$0x10]   ;;  %v1983_v23 = vsel %vm99_vm2, %v2551_v13, %v1979_v18  ;;  %2035 = vrot.lane.b32.xlu1 %v2034_v27, %s2579_s30  ;;  %2059 = vst.msk [vmem:[%s4760_s1 + $0x22] ss:$8 sm:$0xf] %vm6_vm8, %v59_v36   ;;  %v70_v42 = vsel %vm4_vm7, %v2062_v39, %v2061_v38 }
  0x9f   :  { %v2553_v19 = vld [vmem:[%s4759_s0 + $0xb4] sm:$0x20]   ;;  %v1987_v28 = vsel %vm103_vm3, %v2552_v14, %v1983_v23  ;;  %2060 = vst.msk [vmem:[%s4760_s1 + $0x3] ss:$8 sm:$0xf0] %vm6_vm8, %v59_v36  }
  0xa0   :  { %v2554_v20 = vld [vmem:[%s4759_s0 + $0xd3] sm:$0x40]   ;;  %v1991_v31 = vsel %vm107_vm4, %v2553_v19, %v1987_v28  ;;  %v2065_v43 = vld [vmem:[%s4759_s0 + $0x1c0] ss:$8 sm:$0xf]  }
  0xa1   :  { %v2555_v21 = vld [vmem:[%s4759_s0 + $0xf2] sm:$0x80]   ;;  %v1995_v35 = vsel %vm111_vm5, %v2554_v20, %v1991_v31  ;;  %v2066_v44 = vld [vmem:[%s4759_s0 + $0x1c0] ss:$8 sm:$0xf0]   ;;  %v571_v46 = vpop.permute.xlu1 %570  }
  0xa2   :  { %v1999_v40 = vsel %vm115_vm6, %v2555_v21, %v1995_v35  ;;  %2063 = vst.msk [vmem:[%s4760_s1 + $0x24] ss:$8 sm:$0xf] %vm6_vm8, %v70_v42   ;;  %2064 = vst.msk [vmem:[%s4760_s1 + $0x5] ss:$8 sm:$0xf0] %vm6_vm8, %v70_v42   ;;  %v81_v47 = vsel %vm4_vm7, %v2066_v44, %v2065_v43 }
  0xa3   :  { %2000 = vrot.lane.b32.xlu0 %v1999_v40, %s2579_s30  ;;  %v2_v48 = vld [vmem:[%s4759_s0] ss:$8 sm:$0xf]   ;;  %2067 = vst.msk [vmem:[%s4760_s1 + $0x26] ss:$8 sm:$0xf] %vm6_vm8, %v81_v47  }
  0xa4   :  { %v3_v49 = vld [vmem:[%s4759_s0] ss:$8 sm:$0xf0]   ;;  %2068 = vst.msk [vmem:[%s4760_s1 + $0x7] ss:$8 sm:$0xf0] %vm6_vm8, %v81_v47   ;;  %v536_v54 = vpop.permute.xlu0 %535  }
  0xa5   :  { %v5_v50 = vsel %vm4_vm7, %v3_v49, %v2_v48  ;;  %v2041_v51 = vld [vmem:[%s4759_s0 + $0x40] ss:$8 sm:$0xf]   ;;  %2085 = vst.msk [vmem:[%s4760_s1 + $0x20] sm:$0xff] %vm119_vm9, %v4150_v25   ;;  %2103 = vst.msk [vmem:[%s4760_s1 + $0x28] sm:$0xff] %vm119_vm9, %v4112_v7   ;;  %v641_v58 = vpop.permute.xlu1 %640  }
  0xa6   :  { %v2042_v52 = vld [vmem:[%s4759_s0 + $0x40] ss:$8 sm:$0xf0]   ;;  %2121 = vst.msk [vmem:[%s4760_s1 + $0x30] sm:$0xff] %vm119_vm9, %v4176_v37   ;;  %2139 = vst.msk [vmem:[%s4760_s1 + $0x38] sm:$0xff] %vm119_vm9, %v4252_v12  }
  0xa7   :  { %7 = vst.msk [vmem:[%s4760_s1] ss:$8 sm:$0xf] %vm6_vm8, %v5_v50   ;;  %2040 = vst.msk [vmem:[%s4760_s1 - $0x1f] ss:$8 sm:$0xf0] %vm6_vm8, %v5_v50   ;;  %v15_v7 = vsel %vm4_vm7, %v2042_v52, %v2041_v51 }
  0xa8   :  { %v2045_v25 = vld [vmem:[%s4759_s0 + $0x80] ss:$8 sm:$0xf]   ;;  %2156 = vst.msk [vmem:[%s4760_s1 + $0x20] sm:$0xff] %vm398_vm10, %v4316_v45   ;;  %2174 = vst.msk [vmem:[%s4760_s1 + $0x28] sm:$0xff] %vm398_vm10, %v4380_v15  }
  0xa9   :  { %v2046_v37 = vld [vmem:[%s4759_s0 + $0x80] ss:$8 sm:$0xf0]   ;;  %2043 = vst.msk [vmem:[%s4760_s1 + $0x2] ss:$8 sm:$0xf] %vm6_vm8, %v15_v7  }
  0xaa   :  { %2044 = vst.msk [vmem:[%s4760_s1 - $0x1d] ss:$8 sm:$0xf0] %vm6_vm8, %v15_v7   ;;  %v26_v12 = vsel %vm4_vm7, %v2046_v37, %v2045_v25  ;;  %v2049_v45 = vld [vmem:[%s4759_s0 + $0xc0] ss:$8 sm:$0xf]  }
  0xab   :  { %v2050_v55 = vld [vmem:[%s4759_s0 + $0xc0] ss:$8 sm:$0xf0]   ;;  %2192 = vst.msk [vmem:[%s4760_s1 + $0x30] sm:$0xff] %vm398_vm10, %v571_v46   ;;  %2210 = vst.msk [vmem:[%s4760_s1 + $0x38] sm:$0xff] %vm398_vm10, %v641_v58  }
  0xac   :  { %2047 = vst.msk [vmem:[%s4760_s1 + $0x4] ss:$8 sm:$0xf] %vm6_vm8, %v26_v12   ;;  %2048 = vst.msk [vmem:[%s4760_s1 - $0x1b] ss:$8 sm:$0xf0] %vm6_vm8, %v26_v12   ;;  %v37_v56 = vsel %vm4_vm7, %v2050_v55, %v2049_v45 }
  0xad   :  { %2051 = vst.msk [vmem:[%s4760_s1 + $0x6] ss:$8 sm:$0xf] %vm6_vm8, %v37_v56   ;;  %2052 = vst.msk [vmem:[%s4760_s1 - $0x19] ss:$8 sm:$0xf0] %vm6_vm8, %v37_v56  }
  0xae   :  { %120 = vst.msk [vmem:[%s4760_s1] sm:$0xff] %vm119_vm9, %v4074_v53   ;;  %2094 = vst.msk [vmem:[%s4760_s1 + $0x8] sm:$0xff] %vm119_vm9, %v4048_v41   ;;  %v606_v41 = vpop.permute.xlu0 %605   ;;  %v710_v53 = vpop.permute.xlu1 %709  }
  0xaf   :  { %2112 = vst.msk [vmem:[%s4760_s1 + $0x10] sm:$0xff] %vm119_vm9, %v4214_v57   ;;  %2130 = vst.msk [vmem:[%s4760_s1 + $0x18] sm:$0xff] %vm119_vm9, %v4278_v24  }
  0xb0   :  { %399 = vst.msk [vmem:[%s4760_s1] sm:$0xff] %vm398_vm10, %v4354_v1   ;;  %2165 = vst.msk [vmem:[%s4760_s1 + $0x8] sm:$0xff] %vm398_vm10, %v466_v30  }
  0xb1   :  { %2183 = vst.msk [vmem:[%s4760_s1 + $0x10] sm:$0xff] %vm398_vm10, %v536_v54   ;;  %2201 = vst.msk [vmem:[%s4760_s1 + $0x18] sm:$0xff] %vm398_vm10, %v606_v41  }
  0xb2   :  { %2227 = vst.msk [vmem:[%s4760_s1 + $0x20] sm:$0xff] %vm677_vm11, %v710_v53   ;;  %v676_v57 = vpop.permute.xlu0 %675   ;;  %v780_v24 = vpop.permute.xlu1 %779  }
  0xb3   :  { %678 = vst.msk [vmem:[%s4760_s1] sm:$0xff] %vm677_vm11, %v676_v57   ;;  %2245 = vst.msk [vmem:[%s4760_s1 + $0x28] sm:$0xff] %vm677_vm11, %v780_v24  }
  0xb6   :  { %v745_v59 = vpop.permute.xlu0 %744   ;;  %v850_v60 = vpop.permute.xlu1 %849  }
  0xb7   :  { %2236 = vst.msk [vmem:[%s4760_s1 + $0x8] sm:$0xff] %vm677_vm11, %v745_v59   ;;  %2263 = vst.msk [vmem:[%s4760_s1 + $0x30] sm:$0xff] %vm677_vm11, %v850_v60  }
  0xba   :  { %v815_v61 = vpop.permute.xlu0 %814   ;;  %v920_v62 = vpop.permute.xlu1 %919  }
  0xbb   :  { %2254 = vst.msk [vmem:[%s4760_s1 + $0x10] sm:$0xff] %vm677_vm11, %v815_v61   ;;  %2281 = vst.msk [vmem:[%s4760_s1 + $0x38] sm:$0xff] %vm677_vm11, %v920_v62  }
  0xbe   :  { %v885_v63 = vpop.permute.xlu0 %884  }
  0xbf   :  { %2272 = vst.msk [vmem:[%s4760_s1 + $0x18] sm:$0xff] %vm677_vm11, %v885_v63  }
  0xc0   :  { %v989_v0 = vpop.permute.xlu1 %988  }
  0xc1   :  { %2298 = vst.msk [vmem:[%s4760_s1 + $0x20] sm:$0xff] %vm956_vm12, %v989_v0  }
  0xc4   :  { %v955_v1 = vpop.permute.xlu0 %954   ;;  %v1059_v2 = vpop.permute.xlu1 %1058  }
  0xc5   :  { %957 = vst.msk [vmem:[%s4760_s1] sm:$0xff] %vm956_vm12, %v955_v1   ;;  %2316 = vst.msk [vmem:[%s4760_s1 + $0x28] sm:$0xff] %vm956_vm12, %v1059_v2  }
  0xc8   :  { %v1024_v3 = vpop.permute.xlu0 %1023   ;;  %v1129_v4 = vpop.permute.xlu1 %1128  }
  0xc9   :  { %2307 = vst.msk [vmem:[%s4760_s1 + $0x8] sm:$0xff] %vm956_vm12, %v1024_v3   ;;  %2334 = vst.msk [vmem:[%s4760_s1 + $0x30] sm:$0xff] %vm956_vm12, %v1129_v4  }
  0xcc   :  { %v1094_v5 = vpop.permute.xlu0 %1093  }
  0xcd   :  { %2325 = vst.msk [vmem:[%s4760_s1 + $0x10] sm:$0xff] %vm956_vm12, %v1094_v5  }
  0xd0   :  { %v1199_v6 = vpop.permute.xlu1 %1198  }
  0xd1   :  { %2352 = vst.msk [vmem:[%s4760_s1 + $0x38] sm:$0xff] %vm956_vm12, %v1199_v6  }
  0xd4   :  { %v1164_v8 = vpop.permute.xlu0 %1163   ;;  %v1268_v9 = vpop.permute.xlu1 %1267  }
  0xd5   :  { %2343 = vst.msk [vmem:[%s4760_s1 + $0x18] sm:$0xff] %vm956_vm12, %v1164_v8  }
  0xd6   :  { %2369 = vst.msk [vmem:[%s4760_s1 + $0x20] sm:$0xff] %vm1235_vm13, %v1268_v9  }
  0xd8   :  { %v1234_v10 = vpop.permute.xlu0 %1233   ;;  %v1338_v11 = vpop.permute.xlu1 %1337  }
  0xd9   :  { %1236 = vst.msk [vmem:[%s4760_s1] sm:$0xff] %vm1235_vm13, %v1234_v10   ;;  %2387 = vst.msk [vmem:[%s4760_s1 + $0x28] sm:$0xff] %vm1235_vm13, %v1338_v11  }
  0xdc   :  { %v1303_v13 = vpop.permute.xlu0 %1302  }
  0xdd   :  { %2378 = vst.msk [vmem:[%s4760_s1 + $0x8] sm:$0xff] %vm1235_vm13, %v1303_v13  }
  0xe1   :  { %v1408_v14 = vpop.permute.xlu1 %1407  }
  0xe2   :  { %2405 = vst.msk [vmem:[%s4760_s1 + $0x30] sm:$0xff] %vm1235_vm13, %v1408_v14  }
  0xe5   :  { %v1373_v15 = vpop.permute.xlu0 %1372   ;;  %v1478_v16 = vpop.permute.xlu1 %1477  }
  0xe6   :  { %2396 = vst.msk [vmem:[%s4760_s1 + $0x10] sm:$0xff] %vm1235_vm13, %v1373_v15   ;;  %2423 = vst.msk [vmem:[%s4760_s1 + $0x38] sm:$0xff] %vm1235_vm13, %v1478_v16  }
  0xe9   :  { %v1443_v17 = vpop.permute.xlu0 %1442   ;;  %v1547_v18 = vpop.permute.xlu1 %1546  }
  0xea   :  { %2414 = vst.msk [vmem:[%s4760_s1 + $0x18] sm:$0xff] %vm1235_vm13, %v1443_v17  }
  0xeb   :  { %2440 = vst.msk [vmem:[%s4760_s1 + $0x20] sm:$0xff] %vm1514_vm14, %v1547_v18  }
  0xed   :  { %v1513_v19 = vpop.permute.xlu0 %1512  }
  0xee   :  { %1515 = vst.msk [vmem:[%s4760_s1] sm:$0xff] %vm1514_vm14, %v1513_v19  }
  0xf0   :  { %v1617_v20 = vpop.permute.xlu1 %1616  }
  0xf1   :  { %2458 = vst.msk [vmem:[%s4760_s1 + $0x28] sm:$0xff] %vm1514_vm14, %v1617_v20  }
  0xf4   :  { %v1687_v22 = vpop.permute.xlu1 %1686  }
  0xf5   :  { %v1582_v21 = vpop.permute.xlu0 %1581   ;;  %2476 = vst.msk [vmem:[%s4760_s1 + $0x30] sm:$0xff] %vm1514_vm14, %v1687_v22  }
  0xf6   :  { %2449 = vst.msk [vmem:[%s4760_s1 + $0x8] sm:$0xff] %vm1514_vm14, %v1582_v21  }
  0xf8   :  { %v1757_v26 = vpop.permute.xlu1 %1756  }
  0xf9   :  { %v1652_v23 = vpop.permute.xlu0 %1651   ;;  %2494 = vst.msk [vmem:[%s4760_s1 + $0x38] sm:$0xff] %vm1514_vm14, %v1757_v26  }
  0xfa   :  { %2467 = vst.msk [vmem:[%s4760_s1 + $0x10] sm:$0xff] %vm1514_vm14, %v1652_v23  }
  0xfd   :  { %v1722_v27 = vpop.permute.xlu0 %1721  }
  0xfe   :  { %2485 = vst.msk [vmem:[%s4760_s1 + $0x18] sm:$0xff] %vm1514_vm14, %v1722_v27  }
 0x100   :  { %v1826_v28 = vpop.permute.xlu1 %1825  }
 0x101   :  { %2511 = vst.msk [vmem:[%s4760_s1 + $0x20] sm:$0xff] %vm1793_vm15, %v1826_v28  }
 0x104   :  { %v1896_v30 = vpop.permute.xlu1 %1895  }
 0x105   :  { %v1792_v29 = vpop.permute.xlu0 %1791   ;;  %2529 = vst.msk [vmem:[%s4760_s1 + $0x28] sm:$0xff] %vm1793_vm15, %v1896_v30  }
 0x106   :  { %1794 = vst.msk [vmem:[%s4760_s1] sm:$0xff] %vm1793_vm15, %v1792_v29  }
 0x108   :  { %v1966_v32 = vpop.permute.xlu1 %1965  }
 0x109   :  { %v1861_v31 = vpop.permute.xlu0 %1860   ;;  %2547 = vst.msk [vmem:[%s4760_s1 + $0x30] sm:$0xff] %vm1793_vm15, %v1966_v32  }
 0x10a   :  { %2520 = vst.msk [vmem:[%s4760_s1 + $0x8] sm:$0xff] %vm1793_vm15, %v1861_v31  }
 0x10d   :  { %v1931_v33 = vpop.permute.xlu0 %1930  }
 0x10e   :  { %2538 = vst.msk [vmem:[%s4760_s1 + $0x10] sm:$0xff] %vm1793_vm15, %v1931_v33  }
 0x110   :  { %v2036_v34 = vpop.permute.xlu1 %2035  }
 0x111   :  { %2565 = vst.msk [vmem:[%s4760_s1 + $0x38] sm:$0xff] %vm1793_vm15, %v2036_v34  }
 0x115   :  { %v2001_v35 = vpop.permute.xlu0 %2000  }
 0x116   :  { %2556 = vst.msk [vmem:[%s4760_s1 + $0x18] sm:$0xff] %vm1793_vm15, %v2001_v35  }

// kernel: attention_pooling.1
= control target key start
LH: loop header
LB: loop body
LE: loop exit
PB: predicated region body
PF: predicated region fallthrough
CT: control target
= control target key end

     0   :  { %v1000_v47 = vmov 1983009808   ;;  %v91_v49 = vlaneseq  ;;  %s1473_s0 = inlined_call_operand.vmem [shape: f32[2,512], index: 0, kind: input, shape index: {}]   ;;  %s1474_s1 = inlined_call_operand.vmem [shape: f32[512,16], index: 1, kind: input, shape index: {}]   ;;  %s1475_s2 = inlined_call_operand.vmem [shape: f32[16,512], index: 2, kind: input, shape index: {}]   ;;  %s1476_s3 = inlined_call_operand.vmem [shape: f32[512,8], index: 3, kind: input, shape index: {}]   ;;  %s1477_s4 = inlined_call_operand.vmem [shape: f32[1,8], index: 4, kind: input, shape index: {}]   ;;  %s1478_s5 = inlined_call_operand.hbm [shape: f32[2,8], index: 5, kind: output, shape index: {}]  }
   0x1   :  { %v38_v0 = vld [vmem:[%s1474_s1 + $0x80] sm:$0xff]  ;;  %v39_v1 = vld [vmem:[%s1474_s1 + $0x88] sm:$0xff]  ;;  %v40_v11 = vld [vmem:[%s1474_s1 + $0x90] sm:$0xff]  ;;  %v89_v48 = vunpack.c.l.s4 %v1000_v47 }
   0x2   :  { %v70_v2 = vld [vmem:[%s1474_s1 + $0x180] sm:$0xff]  ;;  %v832_v3 = vpack.c.bf16 %v39_v1, %v38_v0  ;;  %v71_v4 = vld [vmem:[%s1474_s1 + $0x188] sm:$0xff]  ;;  %v41_v13 = vld [vmem:[%s1474_s1 + $0x98] sm:$0xff]  ;;  %v92_v0 = vshrl.u32 %v91_v49, 7 }
   0x3   :  { %v22_v5 = vld [vmem:[%s1474_s1] sm:$0xff]  ;;  %v23_v6 = vld [vmem:[%s1474_s1 + $0x8] sm:$0xff]  ;;  %v864_v7 = vpack.c.bf16 %v71_v4, %v70_v2  ;;  %v72_v14 = vld [vmem:[%s1474_s1 + $0x190] sm:$0xff]  ;;  %v836_v16 = vpack.c.bf16 %v41_v13, %v40_v11  ;;  %v90_v63 = vunpack.c.0.s8 %v89_v48 }
   0x4   :  { %v834_v8 = vpack.c.bf16 %v23_v6, %v22_v5  ;;  %v54_v9 = vld [vmem:[%s1474_s1 + $0x100] sm:$0xff]  ;;  %v55_v10 = vld [vmem:[%s1474_s1 + $0x108] sm:$0xff]  ;;  %833 = vmatprep.subr.bf16.mxu0 %v832_v3  ;;  %v73_v15 = vld [vmem:[%s1474_s1 + $0x198] sm:$0xff] }
   0x5   :  { %v866_v12 = vpack.c.bf16 %v55_v10, %v54_v9  ;;  %865 = vmatprep.subr.bf16.mxu1 %v864_v7  ;;  %v868_v17 = vpack.c.bf16 %v73_v15, %v72_v14  ;;  %v24_v18 = vld [vmem:[%s1474_s1 + $0x10] sm:$0xff]  ;;  %v25_v19 = vld [vmem:[%s1474_s1 + $0x18] sm:$0xff]  ;;  %v42_v23 = vld [vmem:[%s1474_s1 + $0xa0] sm:$0xff]  ;;  %v1183_v13 = vsub.s32 %v90_v63, %v92_v0 }
   0x6   :  { %835 = vmatpush3.bf16.msra.mxu0 %v834_v8  ;;  %v56_v20 = vld [vmem:[%s1474_s1 + $0x110] sm:$0xff]  ;;  %v838_v21 = vpack.c.bf16 %v25_v19, %v24_v18  ;;  %v57_v22 = vld [vmem:[%s1474_s1 + $0x118] sm:$0xff]  ;;  %v43_v24 = vld [vmem:[%s1474_s1 + $0xa8] sm:$0xff] }
   0x7   :  { %867 = vmatpush3.bf16.msra.mxu1 %v866_v12  ;;  %837 = vmatprep.subr.bf16.mxu0 %v836_v16  ;;  %v870_v25 = vpack.c.bf16 %v57_v22, %v56_v20  ;;  %v840_v26 = vpack.c.bf16 %v43_v24, %v42_v23  ;;  %v74_v27 = vld [vmem:[%s1474_s1 + $0x1a0] sm:$0xff]  ;;  %v75_v28 = vld [vmem:[%s1474_s1 + $0x1a8] sm:$0xff]  ;;  %v44_v35 = vld [vmem:[%s1474_s1 + $0xb0] sm:$0xff] }
   0x8   :  { %869 = vmatprep.subr.bf16.mxu1 %v868_v17  ;;  %v26_v29 = vld [vmem:[%s1474_s1 + $0x20] sm:$0xff]  ;;  %v872_v30 = vpack.c.bf16 %v75_v28, %v74_v27  ;;  %v27_v31 = vld [vmem:[%s1474_s1 + $0x28] sm:$0xff]  ;;  %v45_v36 = vld [vmem:[%s1474_s1 + $0xb8] sm:$0xff] }
   0x9   :  { %v58_v32 = vld [vmem:[%s1474_s1 + $0x120] sm:$0xff]  ;;  %v59_v33 = vld [vmem:[%s1474_s1 + $0x128] sm:$0xff]  ;;  %v842_v34 = vpack.c.bf16 %v27_v31, %v26_v29  ;;  %v76_v37 = vld [vmem:[%s1474_s1 + $0x1b0] sm:$0xff]  ;;  %v844_v39 = vpack.c.bf16 %v45_v36, %v44_v35 }
   0xa   :  { %839 = vmatpush3.bf16.msra.mxu0 %v838_v21  ;;  %v874_v38 = vpack.c.bf16 %v59_v33, %v58_v32  ;;  %v77_v40 = vld [vmem:[%s1474_s1 + $0x1b8] sm:$0xff]  ;;  %v28_v41 = vld [vmem:[%s1474_s1 + $0x30] sm:$0xff]  ;;  %v46_v46 = vld [vmem:[%s1474_s1 + $0xc0] sm:$0xff] }
   0xb   :  { %871 = vmatpush3.bf16.msra.mxu1 %v870_v25  ;;  %841 = vmatprep.subr.bf16.mxu0 %v840_v26  ;;  %v29_v42 = vld [vmem:[%s1474_s1 + $0x38] sm:$0xff]  ;;  %v876_v43 = vpack.c.bf16 %v77_v40, %v76_v37  ;;  %v60_v44 = vld [vmem:[%s1474_s1 + $0x130] sm:$0xff]  ;;  %v47_v50 = vld [vmem:[%s1474_s1 + $0xc8] sm:$0xff] }
   0xc   :  { %873 = vmatprep.subr.bf16.mxu1 %v872_v30  ;;  %v61_v45 = vld [vmem:[%s1474_s1 + $0x138] sm:$0xff]  ;;  %v78_v51 = vld [vmem:[%s1474_s1 + $0x1c0] sm:$0xff]  ;;  %v79_v52 = vld [vmem:[%s1474_s1 + $0x1c8] sm:$0xff]  ;;  %v846_v53 = vpack.c.bf16 %v29_v42, %v28_v41  ;;  %v848_v55 = vpack.c.bf16 %v47_v50, %v46_v46 }
   0xd   :  { %v878_v54 = vpack.c.bf16 %v61_v45, %v60_v44  ;;  %v30_v56 = vld [vmem:[%s1474_s1 + $0x40] sm:$0xff]  ;;  %v31_v57 = vld [vmem:[%s1474_s1 + $0x48] sm:$0xff]  ;;  %v880_v59 = vpack.c.bf16 %v79_v52, %v78_v51  ;;  %v48_v61 = vld [vmem:[%s1474_s1 + $0xd0] sm:$0xff] }
   0xe   :  { %843 = vmatpush3.bf16.msra.mxu0 %v842_v34  ;;  %v62_v58 = vld [vmem:[%s1474_s1 + $0x140] sm:$0xff]  ;;  %v63_v60 = vld [vmem:[%s1474_s1 + $0x148] sm:$0xff]  ;;  %v49_v62 = vld [vmem:[%s1474_s1 + $0xd8] sm:$0xff]  ;;  %v850_v3 = vpack.c.bf16 %v31_v57, %v30_v56 }
   0xf   :  { %875 = vmatpush3.bf16.msra.mxu1 %v874_v38  ;;  %845 = vmatprep.subr.bf16.mxu0 %v844_v39  ;;  %v80_v1 = vld [vmem:[%s1474_s1 + $0x1d0] sm:$0xff]  ;;  %v81_v2 = vld [vmem:[%s1474_s1 + $0x1d8] sm:$0xff]  ;;  %v882_v4 = vpack.c.bf16 %v63_v60, %v62_v58  ;;  %v852_v5 = vpack.c.bf16 %v49_v62, %v48_v61  ;;  %v50_v11 = vld [vmem:[%s1474_s1 + $0xe0] sm:$0xff] }
  0x10   :  { %877 = vmatprep.subr.bf16.mxu1 %v876_v43  ;;  %v32_v6 = vld [vmem:[%s1474_s1 + $0x50] sm:$0xff]  ;;  %v33_v7 = vld [vmem:[%s1474_s1 + $0x58] sm:$0xff]  ;;  %v884_v9 = vpack.c.bf16 %v81_v2, %v80_v1  ;;  %v51_v12 = vld [vmem:[%s1474_s1 + $0xe8] sm:$0xff] }
  0x11   :  { %v64_v8 = vld [vmem:[%s1474_s1 + $0x150] sm:$0xff]  ;;  %v65_v10 = vld [vmem:[%s1474_s1 + $0x158] sm:$0xff]  ;;  %v82_v14 = vld [vmem:[%s1474_s1 + $0x1e0] sm:$0xff]  ;;  %v854_v16 = vpack.c.bf16 %v33_v7, %v32_v6  ;;  %v856_v20 = vpack.c.bf16 %v51_v12, %v50_v11 }
  0x12   :  { %847 = vmatpush3.bf16.msra.mxu0 %v846_v53  ;;  %v83_v15 = vld [vmem:[%s1474_s1 + $0x1e8] sm:$0xff]  ;;  %v34_v17 = vld [vmem:[%s1474_s1 + $0x60] sm:$0xff]  ;;  %v886_v19 = vpack.c.bf16 %v65_v10, %v64_v8 }
  0x13   :  { %879 = vmatpush3.bf16.msra.mxu1 %v878_v54  ;;  %849 = vmatprep.subr.bf16.mxu0 %v848_v55  ;;  %v35_v18 = vld [vmem:[%s1474_s1 + $0x68] sm:$0xff]  ;;  %v66_v21 = vld [vmem:[%s1474_s1 + $0x160] sm:$0xff] }
  0x14   :  { %881 = vmatprep.subr.bf16.mxu1 %v880_v59  ;;  %v1203_v22 = vld [vmem:[%s1473_s0] sm:$0xff] }
  0x16   :  { %851 = vmatpush3.bf16.msra.mxu0 %v850_v3 }
  0x17   :  { %883 = vmatpush3.bf16.msra.mxu1 %v882_v4  ;;  %853 = vmatprep.subr.bf16.mxu0 %v852_v5 }
  0x18   :  { %10 = vsyncpa [#allocation3], 0  ;;  %885 = vmatprep.subr.bf16.mxu1 %v884_v9  ;;  %v888_v23 = vpack.c.bf16 %v83_v15, %v82_v14  ;;  %v67_v24 = vld [vmem:[%s1474_s1 + $0x168] sm:$0xff]  ;;  %v52_v25 = vld [vmem:[%s1474_s1 + $0xf0] sm:$0xff]  ;;  %v94_v27 = vrot.slane %v1203_v22, %v1183_v13  ;;  %v87_v28 = vcombine.high %v1203_v22, %v1203_v22  ;;  %v858_v31 = vpack.c.bf16 %v35_v18, %v34_v17  ;;  %s1002_s26 = smov [#allocation2]  }
  0x19   :  { %v53_v26 = vld [vmem:[%s1474_s1 + $0xf8] sm:$0xff]  ;;  %v84_v29 = vld [vmem:[%s1474_s1 + $0x1f0] sm:$0xff]  ;;  %v890_v34 = vpack.c.bf16 %v67_v24, %v66_v21  ;;  %vm248_vm0 = vcmask 123904   ;;  %v264_v57 = vld [vmem:[%s1475_s2 + $0x8] sm:$0xff]  ;;  %v1001_v5 = vmov 0.0   ;;  %vm271_vm1 = vcmask 130048  }
  0x1a   :  { %v85_v30 = vld [vmem:[%s1474_s1 + $0x1f8] sm:$0xff]  ;;  %855 = vmatpush3.bf16.msra.mxu0 %v854_v16  ;;  %v102_v32 = vcombine.high %v94_v27, %v94_v27  ;;  %v101_v33 = vrot.slane %v87_v28, %v1183_v13  ;;  %v860_v35 = vpack.c.bf16 %v53_v26, %v52_v25  ;;  %v36_v36 = vld [vmem:[%s1474_s1 + $0x70] sm:$0xff]  ;;  %v268_v58 = vld [vmem:[%s1475_s2 + $0x28] sm:$0xff]  ;;  %s681_s27 = sshll.u32 %s1002_s26, 4  ;;  %vm673_vm2 = vcmask 58368   ;;  %s682_s27 = int_to_ptr.vmem [resolvable:$true] %s681_s27 }
  0x1b   :  { %887 = vmatpush3.bf16.msra.mxu1 %v886_v19  ;;  %857 = vmatprep.subr.bf16.mxu0 %v856_v20  ;;  %v37_v37 = vld [vmem:[%s1474_s1 + $0x78] sm:$0xff]  ;;  %v892_v38 = vpack.c.bf16 %v85_v30, %v84_v29  ;;  %v68_v39 = vld [vmem:[%s1474_s1 + $0x170] sm:$0xff]  ;;  %v896_v60 = vpack.c.bf16 %v268_v58, %v264_v57  ;;  %v263_v62 = vld [vmem:[%s1475_s2] sm:$0xff]  ;;  %s976_s28 = scalar_lea.vmem %s682_s27, 32  ;;  %p981_p1 = scmp.lt.s32.totalorder %s682_s27, %s682_s27 }
  0x1c   :  { %889 = vmatprep.subr.bf16.mxu1 %v888_v23  ;;  %v69_v40 = vld [vmem:[%s1474_s1 + $0x178] sm:$0xff]  ;;  %172 = vmatprep.mubr.f32.mxu0 %v102_v32  ;;  %v103_v41 = vcombine.high %v101_v33, %v101_v33  ;;  %v862_v42 = vpack.c.bf16 %v37_v37, %v36_v36  ;;  %v267_v63 = vld [vmem:[%s1475_s2 + $0x20] sm:$0xff]  ;;  %v265_v2 = vld [vmem:[%s1475_s2 + $0x10] sm:$0xff]  ;;  %p977_p0 = scmp.ne.s32.totalorder %s682_s27, %s976_s28  ;;  %p982_p2 = scmp.lt.s32.totalorder %s976_s28, %s976_s28 }
  0x1d   :  { %v894_v43 = vpack.c.bf16 %v69_v40, %v68_v39  ;;  %v266_v59 = vld [vmem:[%s1475_s2 + $0x18] sm:$0xff]  ;;  %v898_v1 = vpack.c.bf16 %v267_v63, %v263_v62  ;;  %v269_v3 = vld [vmem:[%s1475_s2 + $0x30] sm:$0xff]  ;;  %v456_v6 = vld [vmem:[%s1476_s3 + $0x80] sm:$0xff] }
  0x1e   :  { %859 = vmatpush3.bf16.msra.mxu0 %v858_v31  ;;  %242 = vmatprep.mubr.f32.mxu1 %v103_v41  ;;  %v270_v61 = vld [vmem:[%s1475_s2 + $0x38] sm:$0xff]  ;;  %v902_v4 = vpack.c.bf16 %v269_v3, %v265_v2  ;;  %v457_v7 = vld [vmem:[%s1476_s3 + $0x88] sm:$0xff]  ;;  %v488_v9 = vld [vmem:[%s1476_s3 + $0x180] sm:$0xff]  ;;  %p983_p3 = por %p982_p2, %p981_p1 }
  0x1f   :  { %891 = vmatpush3.bf16.msra.mxu1 %v890_v34  ;;  %861 = vmatprep.subr.bf16.mxu0 %v860_v35  ;;  %v900_v0 = vpack.c.bf16 %v270_v61, %v266_v59  ;;  %v904_v8 = vpack.c.bf16 %v457_v7, %v456_v6  ;;  %v489_v10 = vld [vmem:[%s1476_s3 + $0x188] sm:$0xff]  ;;  %v440_v16 = vld [vmem:[%s1476_s3] sm:$0xff]  ;;  %v458_v21 = vld [vmem:[%s1476_s3 + $0x90] sm:$0xff] }
  0x20   :  { %893 = vmatprep.subr.bf16.mxu1 %v892_v38  ;;  %v936_v11 = vpack.c.bf16 %v489_v10, %v488_v9  ;;  %v441_v17 = vld [vmem:[%s1476_s3 + $0x8] sm:$0xff]  ;;  %v472_v19 = vld [vmem:[%s1476_s3 + $0x100] sm:$0xff]  ;;  %v459_v23 = vld [vmem:[%s1476_s3 + $0x98] sm:$0xff]  ;;  %p984_p4 = pnand %p983_p3, %p977_p0 }
  0x21   :  { %v473_v20 = vld [vmem:[%s1476_s3 + $0x108] sm:$0xff]  ;;  %v490_v24 = vld [vmem:[%s1476_s3 + $0x190] sm:$0xff]  ;;  %v491_v25 = vld [vmem:[%s1476_s3 + $0x198] sm:$0xff]  ;;  %v908_v32 = vpack.c.bf16 %v459_v23, %v458_v21 }
  0x22   :  { %863 = vmatpush3.bf16.msra.mxu0 %v862_v42  ;;  %v938_v28 = vpack.c.bf16 %v473_v20, %v472_v19  ;;  %v442_v29 = vld [vmem:[%s1476_s3 + $0x10] sm:$0xff]  ;;  %v443_v30 = vld [vmem:[%s1476_s3 + $0x18] sm:$0xff]  ;;  %v460_v36 = vld [vmem:[%s1476_s3 + $0xa0] sm:$0xff] }
  0x23   :  { %895 = vmatpush3.bf16.msra.mxu1 %v894_v43  ;;  %897 = vmatprep.subr.bf16.mxu0 %v896_v60  ;;  %v474_v34 = vld [vmem:[%s1476_s3 + $0x110] sm:$0xff]  ;;  %v475_v35 = vld [vmem:[%s1476_s3 + $0x118] sm:$0xff]  ;;  %v461_v37 = vld [vmem:[%s1476_s3 + $0xa8] sm:$0xff]  ;;  %v910_v40 = vpack.c.bf16 %v443_v30, %v442_v29 }
  0x24   :  { %901 = vmatprep.subr.bf16.mxu1 %v900_v0  ;;  %v492_v38 = vld [vmem:[%s1476_s3 + $0x1a0] sm:$0xff]  ;;  %v493_v39 = vld [vmem:[%s1476_s3 + $0x1a8] sm:$0xff]  ;;  %v942_v41 = vpack.c.bf16 %v475_v35, %v474_v34  ;;  %v478_v58 = vld [vmem:[%s1476_s3 + $0x130] sm:$0xff] }
  0x25   :  { %173 = vmatmul.mubr.f32.vlgmr.msra.gmra.mrb[0].mxu0 %v94_v27  ;;  %v906_v27 = vpack.c.bf16 %v441_v17, %v440_v16  ;;  %v444_v42 = vld [vmem:[%s1476_s3 + $0x20] sm:$0xff]  ;;  %v445_v43 = vld [vmem:[%s1476_s3 + $0x28] sm:$0xff]  ;;  %v479_v59 = vld [vmem:[%s1476_s3 + $0x138] sm:$0xff] }
  0x26   :  { %243 = vmatmul.mubr.f32.vlgmr.msra.gmra.mrb[0].mxu1 %v101_v33  ;;  %899 = vmatpush1.bf16.msra.mxu0 %v898_v1  ;;  %v940_v33 = vpack.c.bf16 %v491_v25, %v490_v24  ;;  %v464_v60 = vld [vmem:[%s1476_s3 + $0xc0] sm:$0xff]  ;;  %v465_v61 = vld [vmem:[%s1476_s3 + $0xc8] sm:$0xff]  ;;  %v950_v63 = vpack.c.bf16 %v479_v59, %v478_v58  ;;  %v466_v10 = vld [vmem:[%s1476_s3 + $0xd0] sm:$0xff] }
  0x27   :  { %903 = vmatpush1.bf16.msra.mxu1 %v902_v4  ;;  %339 = vmatprep.mubr.f32.mxu0 %v1001_v5  ;;  %v920_v0 = vpack.c.bf16 %v465_v61, %v464_v60  ;;  %v448_v1 = vld [vmem:[%s1476_s3 + $0x40] sm:$0xff]  ;;  %v449_v2 = vld [vmem:[%s1476_s3 + $0x48] sm:$0xff]  ;;  %v498_v17 = vld [vmem:[%s1476_s3 + $0x1d0] sm:$0xff] }
  0x28   :  { %410 = vmatprep.mubr.f32.mxu1 %v1001_v5  ;;  %905 = vmatprep.subr.bf16.mxu0 %v904_v8  ;;  %v922_v3 = vpack.c.bf16 %v449_v2, %v448_v1  ;;  %v496_v4 = vld [vmem:[%s1476_s3 + $0x1c0] sm:$0xff]  ;;  %v497_v5 = vld [vmem:[%s1476_s3 + $0x1c8] sm:$0xff]  ;;  %v482_v20 = vld [vmem:[%s1476_s3 + $0x150] sm:$0xff] }
  0x29   :  { %937 = vmatprep.subr.bf16.mxu1 %v936_v11  ;;  %v952_v6 = vpack.c.bf16 %v497_v5, %v496_v4  ;;  %v480_v7 = vld [vmem:[%s1476_s3 + $0x140] sm:$0xff]  ;;  %v481_v8 = vld [vmem:[%s1476_s3 + $0x148] sm:$0xff]  ;;  %v467_v11 = vld [vmem:[%s1476_s3 + $0xd8] sm:$0xff] }
  0x2a   :  { %v954_v9 = vpack.c.bf16 %v481_v8, %v480_v7  ;;  %v483_v21 = vld [vmem:[%s1476_s3 + $0x158] sm:$0xff]  ;;  %v468_v24 = vld [vmem:[%s1476_s3 + $0xe0] sm:$0xff]  ;;  %v469_v25 = vld [vmem:[%s1476_s3 + $0xe8] sm:$0xff] }
  0x2b   :  { %v958_v23 = vpack.c.bf16 %v483_v21, %v482_v20  ;;  %v500_v30 = vld [vmem:[%s1476_s3 + $0x1e0] sm:$0xff]  ;;  %v485_v34 = vld [vmem:[%s1476_s3 + $0x168] sm:$0xff] }
  0xf8   :  { %v724_v44 = vpop.f32.mrb[0].mxu0 }
  0xf9   :  { %v759_v45 = vpop.f32.mrb[0].mxu1  ;;  %v725_v46 = vpop.f32.mrb[1].mxu0 }
  0xfa   :  { %v726_v47 = vadd.f32 %v725_v46, %v724_v44  ;;  %v760_v48 = vpop.f32.mrb[1].mxu1  ;;  %v912_v44 = vpack.c.bf16 %v461_v37, %v460_v36  ;;  %v476_v46 = vld [vmem:[%s1476_s3 + $0x120] sm:$0xff]  ;;  %v470_v36 = vld [vmem:[%s1476_s3 + $0xf0] sm:$0xff]  ;;  %v471_v37 = vld [vmem:[%s1476_s3 + $0xf8] sm:$0xff] }
  0xfb   :  { %v761_v49 = vadd.f32 %v760_v48, %v759_v45  ;;  %v944_v45 = vpack.c.bf16 %v493_v39, %v492_v38  ;;  %v462_v48 = vld [vmem:[%s1476_s3 + $0xb0] sm:$0xff]  ;;  %v932_v39 = vpack.c.bf16 %v471_v37, %v470_v36 }
  0xfc   :  { %v454_v38 = vld [vmem:[%s1476_s3 + $0x70] sm:$0xff] }
  0xfd   :  { %v245_v50 = vadd.f32 %v761_v49, %v726_v47  ;;  %v477_v47 = vld [vmem:[%s1476_s3 + $0x128] sm:$0xff]  ;;  %v463_v49 = vld [vmem:[%s1476_s3 + $0xb8] sm:$0xff] }
  0xff   :  { %v249_v51 = vsel %vm248_vm0, %v245_v50, -inf }
 0x100   :  { %250 = vmax.xlane.f32.xlu0 %v249_v51  ;;  %v495_v51 = vld [vmem:[%s1476_s3 + $0x1b8] sm:$0xff] }
 0x18d   :  { %v251_v52 = vpop.xlane.xlu0 %250 }
 0x18e   :  { %v252_v53 = vsub.f32 %v245_v50, %v251_v52  ;;  %v494_v50 = vld [vmem:[%s1476_s3 + $0x1b0] sm:$0xff]  ;;  %v914_v52 = vpack.c.bf16 %v445_v43, %v444_v42  ;;  %v503_v42 = vld [vmem:[%s1476_s3 + $0x1f8] sm:$0xff] }
 0x18f   :  { %v948_v57 = vpack.c.bf16 %v495_v51, %v494_v50 }
 0x190   :  { %v253_v54 = vmul.f32 1.442695, %v252_v53  ;;  %v946_v53 = vpack.c.bf16 %v477_v47, %v476_v46  ;;  %v487_v46 = vld [vmem:[%s1476_s3 + $0x178] sm:$0xff] }
 0x192   :  { %972 = vpow2.f32 %v253_v54  ;;  %v446_v54 = vld [vmem:[%s1476_s3 + $0x30] sm:$0xff] }
 0x19c   :  { %v973_v55 = vpop.eup %972 }
 0x19d   :  { %v255_v56 = vsel %vm248_vm0, %v973_v55, 0.0 }
 0x19e   :  { %256 = vadd.xlane.f32.xlu0 %v255_v56  ;;  %v447_v56 = vld [vmem:[%s1476_s3 + $0x38] sm:$0xff] }
 0x19f   :  { %v918_v62 = vpack.c.bf16 %v447_v56, %v446_v54 }
 0x22b   :  { %v257_v12 = vpop.xlane.xlu0 %256 }
 0x22c   :  { %974 = vrcp.f32 %v257_v12 }
 0x236   :  { %v975_v14 = vpop.eup %974 }
 0x237   :  { %v259_v15 = vmul.f32 %v975_v14, %v257_v12  ;;  %v924_v12 = vpack.c.bf16 %v467_v11, %v466_v10 }
 0x239   :  { %v260_v18 = vsub.f32 2.0, %v259_v15  ;;  %v451_v15 = vld [vmem:[%s1476_s3 + $0x58] sm:$0xff] }
 0x23b   :  { %v261_v26 = vmul.f32 %v975_v14, %v260_v18  ;;  %v450_v14 = vld [vmem:[%s1476_s3 + $0x50] sm:$0xff]  ;;  %v499_v18 = vld [vmem:[%s1476_s3 + $0x1d8] sm:$0xff] }
 0x23c   :  { %v926_v16 = vpack.c.bf16 %v451_v15, %v450_v14  ;;  %v956_v19 = vpack.c.bf16 %v499_v18, %v498_v17 }
 0x23d   :  { %v262_v31 = vmul.f32 %v973_v55, %v261_v26  ;;  %v916_v55 = vpack.c.bf16 %v463_v49, %v462_v48  ;;  %v928_v26 = vpack.c.bf16 %v469_v25, %v468_v24 }
 0x23f   :  { %689 = vmatmul.mubr.msk.f32.vlgmr.msra.gmra.mrb[2].mxu0 %vm271_vm1, %v262_v31  ;;  %690 = vmatmul.mubr.msk.f32.vlgmr.msra.gmra.mrb[2].mxu1 %vm271_vm1, %v262_v31  ;;  %v501_v31 = vld [vmem:[%s1476_s3 + $0x1e8] sm:$0xff] }
 0x240   :  { %907 = vmatpush3.bf16.msra.mxu0 %v906_v27  ;;  %939 = vmatpush3.bf16.msra.mxu1 %v938_v28  ;;  %v452_v27 = vld [vmem:[%s1476_s3 + $0x60] sm:$0xff]  ;;  %v453_v28 = vld [vmem:[%s1476_s3 + $0x68] sm:$0xff] }
 0x241   :  { %909 = vmatprep.subr.bf16.mxu0 %v908_v32  ;;  %941 = vmatprep.subr.bf16.mxu1 %v940_v33  ;;  %v930_v29 = vpack.c.bf16 %v453_v28, %v452_v27  ;;  %v960_v32 = vpack.c.bf16 %v501_v31, %v500_v30  ;;  %v484_v33 = vld [vmem:[%s1476_s3 + $0x160] sm:$0xff] }
 0x242   :  { %v962_v35 = vpack.c.bf16 %v485_v34, %v484_v33 }
 0x244   :  { %911 = vmatpush3.bf16.msra.mxu0 %v910_v40  ;;  %943 = vmatpush3.bf16.msra.mxu1 %v942_v41  ;;  %v455_v40 = vld [vmem:[%s1476_s3 + $0x78] sm:$0xff]  ;;  %v502_v41 = vld [vmem:[%s1476_s3 + $0x1f0] sm:$0xff] }
 0x245   :  { %913 = vmatprep.subr.bf16.mxu0 %v912_v44  ;;  %945 = vmatprep.subr.bf16.mxu1 %v944_v45  ;;  %v934_v43 = vpack.c.bf16 %v455_v40, %v454_v38  ;;  %v964_v44 = vpack.c.bf16 %v503_v42, %v502_v41  ;;  %v486_v45 = vld [vmem:[%s1476_s3 + $0x170] sm:$0xff] }
 0x246   :  { %v966_v47 = vpack.c.bf16 %v487_v46, %v486_v45 }
 0x248   :  { %915 = vmatpush3.bf16.msra.mxu0 %v914_v52  ;;  %947 = vmatpush3.bf16.msra.mxu1 %v946_v53 }
 0x249   :  { %917 = vmatprep.subr.bf16.mxu0 %v916_v55  ;;  %949 = vmatprep.subr.bf16.mxu1 %v948_v57 }
 0x24c   :  { %919 = vmatpush3.bf16.msra.mxu0 %v918_v62  ;;  %951 = vmatpush3.bf16.msra.mxu1 %v950_v63 }
 0x24d   :  { %921 = vmatprep.subr.bf16.mxu0 %v920_v0  ;;  %953 = vmatprep.subr.bf16.mxu1 %v952_v6  ;;  %v691_v0 = vld [vmem:[%s1477_s4] ss:$0 sm:$0xff] }
 0x250   :  { %923 = vmatpush3.bf16.msra.mxu0 %v922_v3  ;;  %955 = vmatpush3.bf16.msra.mxu1 %v954_v9 }
 0x251   :  { %925 = vmatprep.subr.bf16.mxu0 %v924_v12  ;;  %957 = vmatprep.subr.bf16.mxu1 %v956_v19 }
 0x254   :  { %927 = vmatpush3.bf16.msra.mxu0 %v926_v16  ;;  %959 = vmatpush3.bf16.msra.mxu1 %v958_v23 }
 0x255   :  { %929 = vmatprep.subr.bf16.mxu0 %v928_v26  ;;  %961 = vmatprep.subr.bf16.mxu1 %v960_v32 }
 0x258   :  { %931 = vmatpush3.bf16.msra.mxu0 %v930_v29  ;;  %963 = vmatpush3.bf16.msra.mxu1 %v962_v35 }
 0x259   :  { %933 = vmatprep.subr.bf16.mxu0 %v932_v39  ;;  %965 = vmatprep.subr.bf16.mxu1 %v964_v44 }
 0x25c   :  { %935 = vmatpush3.bf16.msra.mxu0 %v934_v43  ;;  %967 = vmatpush3.bf16.msra.mxu1 %v966_v47 }
 0x312   :  { %v341_v48 = vpop.f32.mrb[2].mxu0  ;;  %v412_v49 = vpop.f32.mrb[2].mxu1 }
 0x313   :  { %v343_v50 = vpop.f32.mrb[3].mxu0  ;;  %v414_v51 = vpop.f32.mrb[3].mxu1 }
 0x314   :  { %v421_v52 = vcombine.low %v341_v48, %v343_v50  ;;  %v422_v53 = vcombine.low %v412_v49, %v414_v51 }
 0x316   :  { %v429_v54 = vrot.slane %v421_v52, %v1183_v13  ;;  %v436_v55 = vrot.slane %v422_v53, %v1183_v13 }
 0x318   :  { %v437_v56 = vcombine.low %v429_v54, %v436_v55 }
 0x31a   :  { %v439_v57 = vmul.f32 %v437_v56, %v1203_v22 }
 0x31c   :  { %v519_v58 = vrot.slane %v439_v57, %v1183_v13  ;;  %v512_v59 = vcombine.high %v439_v57, %v439_v57 }
 0x31e   :  { %v527_v60 = vcombine.high %v519_v58, %v519_v58  ;;  %v526_v61 = vrot.slane %v512_v59, %v1183_v13 }
 0x320   :  { %597 = vmatprep.mubr.f32.mxu0 %v527_v60  ;;  %v528_v62 = vcombine.high %v526_v61, %v526_v61 }
 0x321   :  { %598 = vmatmul.mubr.f32.vlgmr.msra.gmra.mrb[4].mxu0 %v519_v58 }
 0x322   :  { %667 = vmatprep.mubr.f32.mxu1 %v528_v62 }
 0x323   :  { %668 = vmatmul.mubr.f32.vlgmr.msra.gmra.mrb[4].mxu1 %v526_v61 }
 0x3f4   :  { %v794_v63 = vpop.f32.mrb[4].mxu0 }
 0x3f5   :  { %v795_v1 = vpop.f32.mrb[5].mxu0 }
 0x3f6   :  { %v796_v2 = vadd.f32 %v795_v1, %v794_v63  ;;  %v829_v3 = vpop.f32.mrb[4].mxu1 }
 0x3f7   :  { %v830_v22 = vpop.f32.mrb[5].mxu1 }
 0x3f8   :  { %v600_v4 = vadd.f32 %v796_v2, %v691_v0  ;;  %v831_v5 = vadd.f32 %v830_v22, %v829_v3 }
 0x3fa   :  { %v670_v13 = vadd.f32 %v831_v5, %v600_v4 }
 0x3fc   :  { %674 = vst.msk [vmem:[#allocation2] sm:$0x3] %vm673_vm2, %v670_v13 }
 0x3fd   :  { %987 = shalt.err (!%p984_p4)
}
 0x3fe   :  { %s988_s30 = scalar_lea.hbm %s1478_s5, 32 }
 0x3ff   :  { %p989_p5 = scmp.ne.s32.totalorder %s1478_s5, %s988_s30  ;;  %p992_p6 = scmp.lt.u32.totalorder %s988_s30, %s1478_s5 }
 0x401   :  { %p994_p7 = pnand %p992_p6, %p989_p5 }
 0x403   :  { %997 = shalt.err (!%p994_p7)
}
 0x404   :  { %684 = dma.vmem_to_hbm [thread:$0]  %s682_s27, 32, %s1478_s5, [#allocation3]  }
 0x405   :  { %998 = dma.done.wait [#allocation3], 32  }
 0x406   :  { %999 = vsyncadd [#allocation3], 4294967264 }
 0x407   :  { %688 = vsyncpa [#allocation3], 1 }

</bundles_post_ra>
